<compile_context>
chip_gen: v5e
topology: v5e:2x2
jax: 0.10.0
libtpu: 0.0.40
codegen_flags: <defaults>
</compile_context>

<pallas_src>
import jax
import jax.numpy as jnp
from jax.experimental import pallas as pl
from jax.experimental.pallas import tpu as pltpu


# ---------------------------------------------------------------------------
# Kernel
# ---------------------------------------------------------------------------
def _ffn_kernel(x_ref, w13_ref, b13_ref, w2_ref, b2_ref, o_ref):
    """One (row-block i, d_ff-slab k) step of
         out = (SiLU(x@W1 + b1) * (x@W3 + b3)) @ W2 + b2.

    w13 holds the k-th tf-wide column slab of W1 and W3 side by side
    ([W1_k | W3_k], shape (d_model, 2*tf)), so one DMA + one MXU pass covers
    both pre-activations.  The f32 output block (block index constant over k)
    is the accumulator for the d_ff reduction -- no extra scratch needed.
    """
    k = pl.program_id(1)
    tf = w2_ref.shape[0]

    # Cast activations to the weight dtype inside the kernel (VPU op, hidden
    # under MXU work) instead of a separate XLA pass in the wrapper.
    x = x_ref[...].astype(w13_ref.dtype)                       # (tm, d_model)

    # linear1 & linear3 for this slab in one MXU matmul, f32 accumulation.
    yz = jnp.dot(x, w13_ref[...], preferred_element_type=jnp.float32)
    yz = yz + b13_ref[...]                                     # (tm, 2*tf)
    y = yz[:, :tf]                                             # linear1 slab
    z = yz[:, tf:]                                             # linear3 slab

    # SiLU(y) * z gating in f32 (sigmoid on EUP, muls on VPU).
    h = (y * jax.nn.sigmoid(y)) * z

    # dropout: identity in eval mode.
    # TODO(synk): training-mode dropout (pltpu.prng_seed / prng_random_bits).

    # Partial linear2 for this slab: bf16 operands on the MXU, f32 accumulate
    # directly into the resident output block.
    partial = jnp.dot(h.astype(w2_ref.dtype), w2_ref[...],
                      preferred_element_type=jnp.float32)      # (tm, d_model)

    @pl.when(k == 0)
    def _():
        o_ref[...] = partial + b2_ref[...]

    @pl.when(k > 0)
    def _():
        o_ref[...] += partial


# ---------------------------------------------------------------------------
# Tiling / budget helpers
# ---------------------------------------------------------------------------
def _round_up(n, m):
    return ((n + m - 1) // m) * m


def _device_budget():
    """(scoped-VMEM budget bytes, target row tile) for the current TPU generation."""
    kind = ""
    try:
        kind = jax.devices()[0].device_kind.lower()
    except Exception:
        pass
    if "v7" in kind:                       # 64 MiB VMEM/TC, ridge ~620 FLOP/B per TC
        return 56 << 20, 512
    if "v6" in kind:                       # 128 MiB VMEM, ridge ~650 FLOP/B
        return 100 << 20, 1024
    if "v5 lite" in kind or "v5e" in kind or "v5lite" in kind:
        return 100 << 20, 512              # 128 MiB VMEM, ridge ~245 FLOP/B
    return 64 << 20, 512                   # conservative default (v4/v5p/unknown)


def _vmem_needed(tm, tf, d_model, w_itemsize):
    """Conservative VMEM estimate: double-buffered blocks plus the
    compiler-materialized (tm, tf) intermediates (yz/h in f32, h in bf16, x cast)."""
    buf = 2
    b = 0
    b += buf * tm * d_model * 4                    # x block (f32)
    b += buf * d_model * (2 * tf) * w_itemsize     # [W1_k | W3_k] slab
    b += buf * 8 * (2 * tf) * 4                    # [b1_k | b3_k] (sublane-padded)
    b += buf * tf * d_model * w_itemsize           # W2 row slab
    b += buf * 8 * d_model * 4                     # b2
    b += buf * tm * d_model * 4                    # output block (f32)
    b += tm * d_model * w_itemsize                 # x cast to weight dtype
    b += tm * (2 * tf) * 4                         # yz (f32)
    b += 2 * tm * tf * 4                           # sigmoid(y), gated h (f32)
    b += tm * tf * w_itemsize                      # h cast to weight dtype
    return b


def _choose_tiles(M, d_model, d_ff, vmem_budget, tm_target, w_itemsize):
    """Prefer the target row tile (arithmetic intensity ~tm FLOP / weight byte) and
    the largest d_ff slab that fits the VMEM budget; tf == d_ff means the weights
    are VMEM-resident and only DMA'd once."""
    tm = min(tm_target, _round_up(M, 8))
    tf_cands = [t for t in range(d_ff, 127, -128) if d_ff % t == 0] or [d_ff]
    while True:
        for tf in tf_cands:
            if _vmem_needed(tm, tf, d_model, w_itemsize) <= vmem_budget:
                return tm, tf
        if tm <= 8:
            return tm, tf_cands[-1]
        tm = max(8, _round_up(tm // 2, 8))


def _fuse_w13(w1, b1, w3, b3, tf):
    """Interleave tf-wide column slabs of W1/W3 (and b1/b3) so slab k of the fused
    array is the contiguous block [W1[:, k*tf:(k+1)*tf] | W3[:, k*tf:(k+1)*tf]].
    (In production, hoist this one-time prep out of the per-call path.)"""
    d_model, d_ff = w1.shape
    kt = d_ff // tf
    w13 = jnp.stack(
        [w1.reshape(d_model, kt, tf), w3.reshape(d_model, kt, tf)], axis=2
    ).reshape(d_model, 2 * d_ff)
    b13 = jnp.stack(
        [b1.reshape(1, kt, tf), b3.reshape(1, kt, tf)], axis=2
    ).reshape(1, 2 * d_ff)
    return w13, b13


# ---------------------------------------------------------------------------
# Wrapper
# ---------------------------------------------------------------------------
def positionwise_feed_forward(x, params, *, tm=None, tf=None):
    """x: (batch, seq, d_model) float32.  params: dict with pre-transposed bf16
    weights w1/w3 (d_model, d_ff), w2 (d_ff, d_model) and f32 biases
    b1/b3 (1, d_ff), b2 (1, d_model)."""
    b, s, d_model = x.shape
    d_ff = params["w1"].shape[1]
    M = b * s
    w_dtype = params["w1"].dtype
    w_itemsize = jnp.dtype(w_dtype).itemsize

    # Lane-dense matmuls and unmasked stores need 128-aligned feature dims.
    assert d_model % 128 == 0, "d_model must be a multiple of 128"
    assert d_ff % 128 == 0, "d_ff must be a multiple of 128"

    vmem_budget, tm_target = _device_budget()
    auto_tm, auto_tf = _choose_tiles(M, d_model, d_ff, vmem_budget, tm_target,
                                     w_itemsize)
    tm = auto_tm if tm is None else tm
    tf = auto_tf if tf is None else tf
    assert tm % 8 == 0, "tm must be a multiple of 8"
    assert d_ff % tf == 0 and tf % 128 == 0, "tf must be a 128-multiple dividing d_ff"

    # Pad rows to a multiple of tm (keeps AI ~tm FLOP / weight byte for awkward M).
    Mp = _round_up(M, tm)
    x2d = x.reshape(M, d_model)
    if Mp != M:
        x2d = jnp.pad(x2d, ((0, Mp - M), (0, 0)))

    w13, b13 = _fuse_w13(params["w1"], params["b1"], params["w3"], params["b3"], tf)

    grid = (Mp // tm, d_ff // tf)
    # tf == d_ff => weight block index constant over the whole grid => DMA'd once.
    weight_passes = 1 if tf == d_ff else grid[0]

    cost = pl.CostEstimate(
        flops=int(6 * Mp * d_model * d_ff + 4 * Mp * d_ff),
        transcendentals=int(Mp * d_ff),
        bytes_accessed=int(Mp * d_model * 4                                   # x
                           + weight_passes * 3 * d_model * d_ff * w_itemsize  # W1,W3,W2
                           + Mp * d_model * 4),                               # out
    )

    out2d = pl.pallas_call(
        _ffn_kernel,
        out_shape=jax.ShapeDtypeStruct((Mp, d_model), jnp.float32),
        grid_spec=pltpu.PrefetchScalarGridSpec(
            num_scalar_prefetch=0,
            grid=grid,
            in_specs=[
                pl.BlockSpec((tm, d_model), lambda i, k: (i, 0)),      # x rows (resident over k)
                pl.BlockSpec((d_model, 2 * tf), lambda i, k: (0, k)),  # [W1_k | W3_k]
                pl.BlockSpec((1, 2 * tf), lambda i, k: (0, k)),        # [b1_k | b3_k]
                pl.BlockSpec((tf, d_model), lambda i, k: (k, 0)),      # W2 row slab
                pl.BlockSpec((1, d_model), lambda i, k: (0, 0)),       # b2
            ],
            out_specs=pl.BlockSpec((tm, d_model), lambda i, k: (i, 0)),
        ),
        compiler_params=pltpu.CompilerParams(
            # TODO(synk): verify "parallel" shards the row axis across both v7x
            # TensorCores; switch to pltpu.CORE_PARALLEL there if it does not.
            dimension_semantics=("parallel", "arbitrary"),
            vmem_limit_bytes=int(vmem_budget),
        ),
        cost_estimate=cost,
    )(x2d, w13, b13, params["w2"], params["b2"])

    if Mp != M:
        out2d = out2d[:M]
    return out2d.reshape(b, s, d_model)


# ---------------------------------------------------------------------------
# Params / reference
# ---------------------------------------------------------------------------
def init_params(key, d_model, d_ff, w_dtype=jnp.bfloat16, b_dtype=jnp.float32):
    """nn.Linear-style init (uniform +-1/sqrt(fan_in)).
    Weights stored pre-transposed (in_features, out_features) in bf16; biases f32."""
    k1, k2, k3, k4, k5, k6 = jax.random.split(key, 6)
    lim1 = 1.0 / float(d_model) ** 0.5
    lim2 = 1.0 / float(d_ff) ** 0.5
    return {
        "w1": jax.random.uniform(k1, (d_model, d_ff), jnp.float32, -lim1, lim1).astype(w_dtype),
        "b1": jax.random.uniform(k2, (1, d_ff), b_dtype, -lim1, lim1),
        "w3": jax.random.uniform(k3, (d_model, d_ff), jnp.float32, -lim1, lim1).astype(w_dtype),
        "b3": jax.random.uniform(k4, (1, d_ff), b_dtype, -lim1, lim1),
        "w2": jax.random.uniform(k5, (d_ff, d_model), jnp.float32, -lim2, lim2).astype(w_dtype),
        "b2": jax.random.uniform(k6, (1, d_model), b_dtype, -lim2, lim2),
    }


def _reference(x, p):
    """Pure-JAX reference with the same bf16 operand / f32 accumulate numerics."""
    xb = x.reshape(-1, x.shape[-1]).astype(p["w1"].dtype)
    y = jnp.dot(xb, p["w1"], preferred_element_type=jnp.float32) + p["b1"]
    z = jnp.dot(xb, p["w3"], preferred_element_type=jnp.float32) + p["b3"]
    h = (y * jax.nn.sigmoid(y)) * z
    out = jnp.dot(h.astype(p["w2"].dtype), p["w2"],
                  preferred_element_type=jnp.float32) + p["b2"]
    return out.reshape(x.shape)


if __name__ == "__main__":
    key = jax.random.PRNGKey(0)
    kx, kp = jax.random.split(key)

    batch, seq, d_model, d_ff = 2, 16, 128, 1024
    x = jax.random.normal(kx, (batch, seq, d_model), jnp.float32)
    params = init_params(kp, d_model, d_ff)
    ref = _reference(x, params)

    # 1) Auto tiles: the whole weight set fits VMEM -> tf == d_ff, grid (1, 1),
    #    weights DMA'd exactly once (resident-weight fast path).
    out = jax.block_until_ready(positionwise_feed_forward(x, params))
    assert out.shape == (batch, seq, d_model)
    err = float(jnp.max(jnp.abs(out - ref)))
    assert jnp.allclose(out, ref, atol=2e-2, rtol=2e-2), f"auto-tile mismatch: {err}"

    # 2) Forced small tiles: exercises the streaming d_ff-reduction path
    #    (accumulation into the resident output block) and the row-padding path
    #    (M=32 padded to 48 for tm=24).
    out2 = jax.block_until_ready(positionwise_feed_forward(x, params, tm=24, tf=256))
    err2 = float(jnp.max(jnp.abs(out2 - ref)))
    assert jnp.allclose(out2, ref, atol=2e-2, rtol=2e-2), f"streaming-tile mismatch: {err2}"

    print("KERNEL_OK")
</pallas_src>

<mosaic_0001>
module attributes {stable_mosaic.version = 11 : i64} {
  func.func @_ffn_kernel(%arg0: i32, %arg1: i32, %arg2: memref<32x128xf32, #tpu.memory_space<vmem>>, %arg3: memref<128x2048xbf16, #tpu.memory_space<vmem>>, %arg4: memref<1x2048xf32, #tpu.memory_space<vmem>>, %arg5: memref<1024x128xbf16, #tpu.memory_space<vmem>>, %arg6: memref<1x128xf32, #tpu.memory_space<vmem>>, %arg7: memref<32x128xf32, #tpu.memory_space<vmem>>) attributes {dimension_semantics = [#tpu.dimension_semantics<parallel>, #tpu.dimension_semantics<arbitrary>], iteration_bounds = array<i64: 1, 1>, scalar_prefetch = 0 : i64, scratch_operands = 0 : i64, tpu.core_type = #tpu.core_type<tc>, window_params = [{transform_indices = @transform_0, window_bounds = array<i64: 32, 128>}, {transform_indices = @transform_1, window_bounds = array<i64: 128, 2048>}, {transform_indices = @transform_2, window_bounds = array<i64: 1, 2048>}, {transform_indices = @transform_3, window_bounds = array<i64: 1024, 128>}, {pipeline_mode = #tpu.pipeline_mode<synchronous>, transform_indices = @transform_4, window_bounds = array<i64: 1, 128>}, {transform_indices = @transform_5, window_bounds = array<i64: 32, 128>}]} {
    %c0 = arith.constant 0 : index
    %c0_0 = arith.constant 0 : index
    %0 = vector.load %arg2[%c0, %c0_0] : memref<32x128xf32, #tpu.memory_space<vmem>>, vector<32x128xf32>
    %1 = arith.truncf %0 : vector<32x128xf32> to vector<32x128xbf16>
    %c0_1 = arith.constant 0 : index
    %c0_2 = arith.constant 0 : index
    %2 = vector.load %arg3[%c0_1, %c0_2] : memref<128x2048xbf16, #tpu.memory_space<vmem>>, vector<128x2048xbf16>
    %cst = arith.constant dense<0.000000e+00> : vector<32x2048xf32>
    %3 = tpu.matmul %1, %2, %cst {dimension_numbers = #tpu.dot_dimension_numbers<[1], [0], [0], [1], [0, 0, 1, 1], [], []>} : vector<32x128xbf16>, vector<128x2048xbf16>, vector<32x2048xf32> -> vector<32x2048xf32>
    %c0_3 = arith.constant 0 : index
    %c0_4 = arith.constant 0 : index
    %4 = vector.load %arg4[%c0_3, %c0_4] : memref<1x2048xf32, #tpu.memory_space<vmem>>, vector<1x2048xf32>
    %5 = vector.broadcast %4 : vector<1x2048xf32> to vector<32x2048xf32>
    %6 = arith.addf %3, %5 : vector<32x2048xf32>
    %7 = vector.extract_strided_slice %6 {offsets = [0, 0], sizes = [32, 1024], strides = [1, 1]} : vector<32x2048xf32> to vector<32x1024xf32>
    %8 = vector.extract_strided_slice %6 {offsets = [0, 1024], sizes = [32, 1024], strides = [1, 1]} : vector<32x2048xf32> to vector<32x1024xf32>
    %9 = arith.negf %7 : vector<32x1024xf32>
    %10 = math.exp %9 : vector<32x1024xf32>
    %cst_5 = arith.constant 1.000000e+00 : f32
    %11 = vector.broadcast %cst_5 : f32 to vector<32x1024xf32>
    %12 = arith.addf %11, %10 : vector<32x1024xf32>
    %13 = arith.divf %11, %12 : vector<32x1024xf32>
    %14 = arith.mulf %7, %13 : vector<32x1024xf32>
    %15 = arith.mulf %14, %8 : vector<32x1024xf32>
    %16 = arith.truncf %15 : vector<32x1024xf32> to vector<32x1024xbf16>
    %c0_6 = arith.constant 0 : index
    %c0_7 = arith.constant 0 : index
    %17 = vector.load %arg5[%c0_6, %c0_7] : memref<1024x128xbf16, #tpu.memory_space<vmem>>, vector<1024x128xbf16>
    %cst_8 = arith.constant dense<0.000000e+00> : vector<32x128xf32>
    %18 = tpu.matmul %16, %17, %cst_8 {dimension_numbers = #tpu.dot_dimension_numbers<[1], [0], [0], [1], [0, 0, 1, 1], [], []>} : vector<32x1024xbf16>, vector<1024x128xbf16>, vector<32x128xf32> -> vector<32x128xf32>
    %c0_i32 = arith.constant 0 : i32
    %19 = arith.cmpi eq, %arg1, %c0_i32 : i32
    %20 = arith.extui %19 : i1 to i32
    %c0_i32_9 = arith.constant 0 : i32
    %21 = arith.cmpi ne, %20, %c0_i32_9 : i32
    scf.if %21 {
      %c0_12 = arith.constant 0 : index
      %c0_13 = arith.constant 0 : index
      %25 = vector.load %arg6[%c0_12, %c0_13] : memref<1x128xf32, #tpu.memory_space<vmem>>, vector<1x128xf32>
      %26 = vector.broadcast %25 : vector<1x128xf32> to vector<32x128xf32>
      %27 = arith.addf %18, %26 : vector<32x128xf32>
      %c0_14 = arith.constant 0 : index
      %c0_15 = arith.constant 0 : index
      %28 = vector.load %arg7[%c0_14, %c0_15] : memref<32x128xf32, #tpu.memory_space<vmem>>, vector<32x128xf32>
      tpu.vector_store %arg7[%c0_14, %c0_15], %27 {strides = array<i32>} : memref<32x128xf32, #tpu.memory_space<vmem>>, vector<32x128xf32>,
    } else {
    }
    %c0_i32_10 = arith.constant 0 : i32
    %22 = arith.cmpi sgt, %arg1, %c0_i32_10 : i32
    %23 = arith.extui %22 : i1 to i32
    %c0_i32_11 = arith.constant 0 : i32
    %24 = arith.cmpi ne, %23, %c0_i32_11 : i32
    scf.if %24 {
      %c0_12 = arith.constant 0 : index
      %c0_13 = arith.constant 0 : index
      %25 = vector.load %arg7[%c0_12, %c0_13] : memref<32x128xf32, #tpu.memory_space<vmem>>, vector<32x128xf32>
      %26 = arith.addf %25, %18 : vector<32x128xf32>
      %c0_14 = arith.constant 0 : index
      %c0_15 = arith.constant 0 : index
      %27 = vector.load %arg7[%c0_14, %c0_15] : memref<32x128xf32, #tpu.memory_space<vmem>>, vector<32x128xf32>
      tpu.vector_store %arg7[%c0_14, %c0_15], %26 {strides = array<i32>} : memref<32x128xf32, #tpu.memory_space<vmem>>, vector<32x128xf32>,
    } else {
    }
    return
  }
  func.func @transform_0(%arg0: i32, %arg1: i32) -> (i32, i32) {
    %c0_i32 = arith.constant 0 : i32
    %c0_i32_0 = arith.constant 0 : i32
    return %arg0, %c0_i32 : i32, i32
  }
  func.func @transform_1(%arg0: i32, %arg1: i32) -> (i32, i32) {
    %c0_i32 = arith.constant 0 : i32
    %c0_i32_0 = arith.constant 0 : i32
    return %c0_i32, %arg1 : i32, i32
  }
  func.func @transform_2(%arg0: i32, %arg1: i32) -> (i32, i32) {
    %c0_i32 = arith.constant 0 : i32
    %c0_i32_0 = arith.constant 0 : i32
    return %c0_i32, %arg1 : i32, i32
  }
  func.func @transform_3(%arg0: i32, %arg1: i32) -> (i32, i32) {
    %c0_i32 = arith.constant 0 : i32
    %c0_i32_0 = arith.constant 0 : i32
    return %arg1, %c0_i32 : i32, i32
  }
  func.func @transform_4(%arg0: i32, %arg1: i32) -> (i32, i32) {
    %c0_i32 = arith.constant 0 : i32
    %c0_i32_0 = arith.constant 0 : i32
    %c0_i32_1 = arith.constant 0 : i32
    return %c0_i32, %c0_i32_0 : i32, i32
  }
  func.func @transform_5(%arg0: i32, %arg1: i32) -> (i32, i32) {
    %c0_i32 = arith.constant 0 : i32
    %c0_i32_0 = arith.constant 0 : i32
    return %arg0, %c0_i32 : i32, i32
  }
}

</mosaic_0001>

<bundles_post_ra>
// kernel: tpu_custom_call.1
= control target key start
LH: loop header
LB: loop body
LE: loop exit
PB: predicated region body
PF: predicated region fallthrough
CT: control target
= control target key end

     0   :  { %10 = vsyncpa [#allocation3], 0  ;;  %s5366_s0 = inlined_call_operand.hbm [shape: f32[32,128], index: 0, kind: input, shape index: {}]   ;;  %s5367_s1 = inlined_call_operand.hbm [shape: bf16[128,2048], index: 1, kind: input, shape index: {}]   ;;  %s5368_s2 = inlined_call_operand.hbm [shape: f32[1,2048], index: 2, kind: input, shape index: {}]   ;;  %s5369_s3 = inlined_call_operand.hbm [shape: bf16[1024,128], index: 3, kind: input, shape index: {}]   ;;  %s5370_s4 = inlined_call_operand.vmem [shape: f32[1,128], index: 4, kind: input, shape index: {}]   ;;  %s5371_s5 = inlined_call_operand.hbm [shape: f32[32,128], index: 5, kind: output, shape index: {}]  }
   0x1   :  { %11 = vsyncpa [#allocation6], 0 }
   0x2   :  { %12 = vsyncpa [#allocation9], 0  ;;  %s31_s20 = sshll.u32 %s5367_s1, 4  ;;  %s32_s20 = int_to_ptr.hbm [resolvable:$true] %s31_s20 }
   0x3   :  { %13 = vsyncpa [#allocation4], 0  ;;  %s3860_s21 = smov [#allocation5]   ;;  %s18_s25 = sshll.u32 %s5366_s0, 4  ;;  %s19_s25 = int_to_ptr.hbm [resolvable:$true] %s18_s25 }
   0x4   :  { %s33_s22 = sshll.u32 %s3860_s21, 4  ;;  %s3861_s26 = smov 1024   ;;  %s34_s22 = int_to_ptr.vmem [resolvable:$true] %s33_s22 }
   0x5   :  { %s3862_s27 = smov 64   ;;  %s3863_s28 = smov [#allocation2]  }
   0x6   :  { %39 = dma.hbm_to_vmem [thread:$0]  %s32_s20, 16384, %s34_s22, [#allocation6], %s3861_s26, %s3861_s26, %s3862_s27  }
   0x7   :  { %s20_s29 = sshll.u32 %s3863_s28, 4  ;;  %s3864_s30 = smov 128   ;;  %s21_s29 = int_to_ptr.vmem [resolvable:$true] %s20_s29 }
   0x8   :  { %s3865_s6 = smov 8   ;;  %s45_s8 = sshll.u32 %s5368_s2, 4  ;;  %s46_s8 = int_to_ptr.hbm [resolvable:$true] %s45_s8 }
   0x9   :  { %26 = dma.hbm_to_vmem [thread:$0]  %s19_s25, 512, %s21_s29, [#allocation3], %s3864_s30, %s3864_s30, %s3865_s6  }
   0xa   :  { %s3866_s9 = smov [#allocation7]   ;;  %s55_s12 = sshll.u32 %s5369_s3, 4  ;;  %s56_s12 = int_to_ptr.hbm [resolvable:$true] %s55_s12 }
   0xb   :  { %s47_s0 = sshll.u32 %s3866_s9, 4  ;;  %s3867_s13 = smov [#allocation8]   ;;  %s48_s0 = int_to_ptr.vmem [resolvable:$true] %s47_s0 }
   0xc   :  { %50 = dma.hbm_to_vmem [thread:$0]  %s46_s8, 256, %s48_s0, [#allocation6]  }
   0xd   :  { %s57_s14 = sshll.u32 %s3867_s13, 4  ;;  %s3868_s15 = smov 4   ;;  %s58_s14 = int_to_ptr.vmem [resolvable:$true] %s57_s14 }
   0xe   :  { %63 = dma.hbm_to_vmem [thread:$0]  %s56_s12, 8192, %s58_s14, [#allocation9], %s3862_s27, %s3862_s27, %s3868_s15  }
   0xf   :  { %3852 = dma.done.wait [#allocation3], 512  }
  0x10   :  { %3853 = vsyncadd [#allocation3], 4294966784 }
  0x11   :  { %3854 = dma.done.wait [#allocation6], 16640  }
  0x12   :  { %3855 = vsyncadd [#allocation6], 4294950656 }
  0x13   :  { %3856 = dma.done.wait [#allocation9], 8192  }
  0x14   :  { %3857 = vsyncadd [#allocation9], 4294959104  ;;  %v3051_v0 = vld [vmem:[#allocation5 + $0x380] sm:$0xf]  ;;  %v3513_v2 = vld [vmem:[#allocation5 + $0x384] sm:$0xf] }
  0x15   :  { %v3521_v1 = vld [vmem:[#allocation5 + $0x3bc] sm:$0xf0]  ;;  %v3053_v4 = vld [vmem:[#allocation5 + $0x3c0] sm:$0xf0]  ;;  %v3059_v5 = vld [vmem:[#allocation5 + $0x388] sm:$0xf] }
  0x16   :  { %v3052_v3 = vor.u32 %v3521_v1, %v3051_v0  ;;  %v3522_v6 = vld [vmem:[#allocation5 + $0x3c4] sm:$0xf0]  ;;  %v3056_v7 = vor.u32 %v3513_v2, %v3053_v4  ;;  %v3514_v9 = vld [vmem:[#allocation5 + $0x38c] sm:$0xf]  ;;  %v2987_v11 = vld [vmem:[#allocation5 + $0x300] sm:$0xf] }
  0x17   :  { %v3060_v8 = vor.u32 %v3522_v6, %v3059_v5  ;;  %v3061_v10 = vld [vmem:[#allocation5 + $0x3c8] sm:$0xf0]  ;;  %v3505_v13 = vld [vmem:[#allocation5 + $0x33c] sm:$0xf0]  ;;  %v3497_v14 = vld [vmem:[#allocation5 + $0x304] sm:$0xf] }
  0x18   :  { %892 = vmatpush.bf16.msra.mxu0 %v3052_v3  ;;  %v3064_v12 = vor.u32 %v3514_v9, %v3061_v10  ;;  %v2989_v15 = vld [vmem:[#allocation5 + $0x340] sm:$0xf0]  ;;  %911 = vmatpush.bf16.msra.mxu1 %v3056_v7  ;;  %v2988_v16 = vor.u32 %v3505_v13, %v2987_v11  ;;  %v2995_v18 = vld [vmem:[#allocation5 + $0x308] sm:$0xf]  ;;  %v3498_v20 = vld [vmem:[#allocation5 + $0x30c] sm:$0xf] }
  0x19   :  { %930 = vmatpush.bf16.msra.mxu2 %v3060_v8  ;;  %v2992_v17 = vor.u32 %v3497_v14, %v2989_v15  ;;  %v3506_v19 = vld [vmem:[#allocation5 + $0x344] sm:$0xf0]  ;;  %v2997_v22 = vld [vmem:[#allocation5 + $0x348] sm:$0xf0]  ;;  %v2923_v23 = vld [vmem:[#allocation5 + $0x280] sm:$0xf] }
  0x1a   :  { %949 = vmatpush.bf16.msra.mxu3 %v3064_v12  ;;  %v2996_v21 = vor.u32 %v3506_v19, %v2995_v18  ;;  %v3489_v24 = vld [vmem:[#allocation5 + $0x2bc] sm:$0xf0]  ;;  %v3000_v25 = vor.u32 %v3498_v20, %v2997_v22  ;;  %v3481_v26 = vld [vmem:[#allocation5 + $0x284] sm:$0xf]  ;;  %v2931_v28 = vld [vmem:[#allocation5 + $0x288] sm:$0xf] }
  0x1b   :  { %v2925_v27 = vld [vmem:[#allocation5 + $0x2c0] sm:$0xf0]  ;;  %v2924_v29 = vor.u32 %v3489_v24, %v2923_v23  ;;  %v3490_v30 = vld [vmem:[#allocation5 + $0x2c4] sm:$0xf0]  ;;  %v3482_v31 = vld [vmem:[#allocation5 + $0x28c] sm:$0xf] }
  0x1c   :  { %893 = vmatpush.bf16.msra.mxu0 %v2988_v16  ;;  %v2933_v32 = vld [vmem:[#allocation5 + $0x2c8] sm:$0xf0]  ;;  %912 = vmatpush.bf16.msra.mxu1 %v2992_v17  ;;  %v2928_v33 = vor.u32 %v3481_v26, %v2925_v27  ;;  %v2932_v34 = vor.u32 %v3490_v30, %v2931_v28  ;;  %v2859_v35 = vld [vmem:[#allocation5 + $0x200] sm:$0xf]  ;;  %v3465_v37 = vld [vmem:[#allocation5 + $0x204] sm:$0xf] }
  0x1d   :  { %931 = vmatpush.bf16.msra.mxu2 %v2996_v21  ;;  %v3473_v36 = vld [vmem:[#allocation5 + $0x23c] sm:$0xf0]  ;;  %v2936_v38 = vor.u32 %v3482_v31, %v2933_v32  ;;  %v2861_v39 = vld [vmem:[#allocation5 + $0x240] sm:$0xf0]  ;;  %v2867_v40 = vld [vmem:[#allocation5 + $0x208] sm:$0xf] }
  0x1e   :  { %950 = vmatpush.bf16.msra.mxu3 %v3000_v25  ;;  %v3474_v41 = vld [vmem:[#allocation5 + $0x244] sm:$0xf0]  ;;  %v3466_v42 = vld [vmem:[#allocation5 + $0x20c] sm:$0xf]  ;;  %v2860_v44 = vor.u32 %v3473_v36, %v2859_v35  ;;  %v2864_v45 = vor.u32 %v3465_v37, %v2861_v39  ;;  %v2795_v47 = vld [vmem:[#allocation5 + $0x180] sm:$0xf] }
  0x1f   :  { %v2869_v43 = vld [vmem:[#allocation5 + $0x248] sm:$0xf0]  ;;  %v2868_v46 = vor.u32 %v3474_v41, %v2867_v40  ;;  %v3457_v48 = vld [vmem:[#allocation5 + $0x1bc] sm:$0xf0]  ;;  %v3449_v49 = vld [vmem:[#allocation5 + $0x184] sm:$0xf] }
  0x20   :  { %894 = vmatpush.bf16.msra.mxu0 %v2924_v29  ;;  %913 = vmatpush.bf16.msra.mxu1 %v2928_v33  ;;  %v2872_v50 = vor.u32 %v3466_v42, %v2869_v43  ;;  %v2797_v51 = vld [vmem:[#allocation5 + $0x1c0] sm:$0xf0]  ;;  %v2803_v52 = vld [vmem:[#allocation5 + $0x188] sm:$0xf]  ;;  %v3450_v54 = vld [vmem:[#allocation5 + $0x18c] sm:$0xf]  ;;  %v2796_v56 = vor.u32 %v3457_v48, %v2795_v47 }
  0x21   :  { %932 = vmatpush.bf16.msra.mxu2 %v2932_v34  ;;  %v3458_v53 = vld [vmem:[#allocation5 + $0x1c4] sm:$0xf0]  ;;  %v2805_v55 = vld [vmem:[#allocation5 + $0x1c8] sm:$0xf0]  ;;  %v2800_v57 = vor.u32 %v3449_v49, %v2797_v51  ;;  %v2731_v59 = vld [vmem:[#allocation5 + $0x100] sm:$0xf] }
  0x22   :  { %951 = vmatpush.bf16.msra.mxu3 %v2936_v38  ;;  %v2804_v58 = vor.u32 %v3458_v53, %v2803_v52  ;;  %v3441_v60 = vld [vmem:[#allocation5 + $0x13c] sm:$0xf0]  ;;  %v3433_v61 = vld [vmem:[#allocation5 + $0x104] sm:$0xf]  ;;  %v2808_v62 = vor.u32 %v3450_v54, %v2805_v55  ;;  %v2739_v0 = vld [vmem:[#allocation5 + $0x108] sm:$0xf] }
  0x23   :  { %v2733_v63 = vld [vmem:[#allocation5 + $0x140] sm:$0xf0]  ;;  %v3442_v1 = vld [vmem:[#allocation5 + $0x144] sm:$0xf0]  ;;  %v3434_v2 = vld [vmem:[#allocation5 + $0x10c] sm:$0xf]  ;;  %v2732_v4 = vor.u32 %v3441_v60, %v2731_v59 }
  0x24   :  { %895 = vmatpush.bf16.msra.mxu0 %v2860_v44  ;;  %914 = vmatpush.bf16.msra.mxu1 %v2864_v45  ;;  %v2741_v3 = vld [vmem:[#allocation5 + $0x148] sm:$0xf0]  ;;  %v2736_v5 = vor.u32 %v3433_v61, %v2733_v63  ;;  %v2740_v6 = vor.u32 %v3442_v1, %v2739_v0  ;;  %v2667_v7 = vld [vmem:[#allocation5 + $0x80] sm:$0xf]  ;;  %v3417_v9 = vld [vmem:[#allocation5 + $0x84] sm:$0xf] }
  0x25   :  { %933 = vmatpush.bf16.msra.mxu2 %v2868_v46  ;;  %v3425_v8 = vld [vmem:[#allocation5 + $0xbc] sm:$0xf0]  ;;  %v2744_v10 = vor.u32 %v3434_v2, %v2741_v3  ;;  %v2669_v11 = vld [vmem:[#allocation5 + $0xc0] sm:$0xf0]  ;;  %v2675_v12 = vld [vmem:[#allocation5 + $0x88] sm:$0xf] }
  0x26   :  { %952 = vmatpush.bf16.msra.mxu3 %v2872_v50  ;;  %v3426_v13 = vld [vmem:[#allocation5 + $0xc4] sm:$0xf0]  ;;  %v3418_v14 = vld [vmem:[#allocation5 + $0x8c] sm:$0xf]  ;;  %v2668_v16 = vor.u32 %v3425_v8, %v2667_v7  ;;  %v2603_v17 = vld [vmem:[#allocation5] sm:$0xf]  ;;  %v2672_v19 = vor.u32 %v3417_v9, %v2669_v11 }
  0x27   :  { %v2677_v15 = vld [vmem:[#allocation5 + $0xc8] sm:$0xf0]  ;;  %v3409_v18 = vld [vmem:[#allocation5 + $0x3c] sm:$0xf0]  ;;  %v2676_v20 = vor.u32 %v3426_v13, %v2675_v12  ;;  %v3401_v21 = vld [vmem:[#allocation5 + $0x4] sm:$0xf] }
  0x28   :  { %896 = vmatpush.bf16.msra.mxu0 %v2796_v56  ;;  %915 = vmatpush.bf16.msra.mxu1 %v2800_v57  ;;  %v2605_v22 = vld [vmem:[#allocation5 + $0x40] sm:$0xf0]  ;;  %v2611_v23 = vld [vmem:[#allocation5 + $0x8] sm:$0xf]  ;;  %v2680_v24 = vor.u32 %v3418_v14, %v2677_v15  ;;  %v3402_v26 = vld [vmem:[#allocation5 + $0xc] sm:$0xf]  ;;  %v2604_v31 = vor.u32 %v3409_v18, %v2603_v17 }
  0x29   :  { %934 = vmatpush.bf16.msra.mxu2 %v2804_v58  ;;  %v3410_v25 = vld [vmem:[#allocation5 + $0x44] sm:$0xf0]  ;;  %v2613_v27 = vld [vmem:[#allocation5 + $0x48] sm:$0xf0]  ;;  %v82_v28 = vld [vmem:[#allocation2] sm:$0xff]  ;;  %v2608_v35 = vor.u32 %v3401_v21, %v2605_v22  ;;  %s2586_s19 = sshll.u32 %s5371_s5, 4  ;;  %s2587_s19 = int_to_ptr.hbm [resolvable:$true] %s2586_s19 }
  0x2a   :  { %953 = vmatpush.bf16.msra.mxu3 %v2808_v62  ;;  %v3075_v29 = vld [vmem:[#allocation5 + $0x398] sm:$0xf]  ;;  %v83_v32 = vld [vmem:[#allocation2 + $0x8] sm:$0xff]  ;;  %v3515_v33 = vld [vmem:[#allocation5 + $0x394] sm:$0xf]  ;;  %v2612_v36 = vor.u32 %v3410_v25, %v2611_v23  ;;  %v2616_v37 = vor.u32 %v3402_v26, %v2613_v27 }
  0x2b   :  { %v3524_v30 = vld [vmem:[#allocation5 + $0x3d4] sm:$0xf0]  ;;  %v3069_v34 = vld [vmem:[#allocation5 + $0x3d0] sm:$0xf0]  ;;  %v3067_v39 = vld [vmem:[#allocation5 + $0x390] sm:$0xf]  ;;  %v3915_v42 = vpack.c.bf16 %v83_v32, %v82_v28 }
  0x2c   :  { %897 = vmatpush.bf16.msra.mxu0 %v2732_v4  ;;  %916 = vmatpush.bf16.msra.mxu1 %v2736_v5  ;;  %v3076_v38 = vor.u32 %v3524_v30, %v3075_v29  ;;  %v3523_v40 = vld [vmem:[#allocation5 + $0x3cc] sm:$0xf0]  ;;  %v3516_v41 = vld [vmem:[#allocation5 + $0x39c] sm:$0xf]  ;;  %v3072_v43 = vor.u32 %v3515_v33, %v3069_v34  ;;  %v3011_v45 = vld [vmem:[#allocation5 + $0x318] sm:$0xf] }
  0x2d   :  { %935 = vmatpush.bf16.msra.mxu2 %v2740_v6  ;;  %v3077_v44 = vld [vmem:[#allocation5 + $0x3d8] sm:$0xf0]  ;;  %v3508_v46 = vld [vmem:[#allocation5 + $0x354] sm:$0xf0]  ;;  %v3499_v47 = vld [vmem:[#allocation5 + $0x314] sm:$0xf]  ;;  %v3068_v49 = vor.u32 %v3523_v40, %v3067_v39 }
  0x2e   :  { %954 = vmatpush.bf16.msra.mxu3 %v2744_v10  ;;  %v3005_v48 = vld [vmem:[#allocation5 + $0x350] sm:$0xf0]  ;;  %v3080_v50 = vor.u32 %v3516_v41, %v3077_v44  ;;  %v3012_v51 = vor.u32 %v3508_v46, %v3011_v45  ;;  %v3003_v52 = vld [vmem:[#allocation5 + $0x310] sm:$0xf]  ;;  %v3500_v54 = vld [vmem:[#allocation5 + $0x31c] sm:$0xf] }
  0x2f   :  { %v3507_v53 = vld [vmem:[#allocation5 + $0x34c] sm:$0xf0]  ;;  %v3008_v55 = vor.u32 %v3499_v47, %v3005_v48  ;;  %v3013_v56 = vld [vmem:[#allocation5 + $0x358] sm:$0xf0]  ;;  %v2947_v57 = vld [vmem:[#allocation5 + $0x298] sm:$0xf] }
  0x30   :  { %898 = vmatpush.bf16.msra.mxu0 %v2668_v16  ;;  %917 = vmatpush.bf16.msra.mxu1 %v2672_v19  ;;  %v3492_v58 = vld [vmem:[#allocation5 + $0x2d4] sm:$0xf0]  ;;  %v3483_v59 = vld [vmem:[#allocation5 + $0x294] sm:$0xf]  ;;  %v3004_v61 = vor.u32 %v3507_v53, %v3003_v52  ;;  %v3016_v62 = vor.u32 %v3500_v54, %v3013_v56  ;;  %v2939_v0 = vld [vmem:[#allocation5 + $0x290] sm:$0xf] }
  0x31   :  { %936 = vmatpush.bf16.msra.mxu2 %v2676_v20  ;;  %v2941_v60 = vld [vmem:[#allocation5 + $0x2d0] sm:$0xf0]  ;;  %v2948_v63 = vor.u32 %v3492_v58, %v2947_v57  ;;  %v3491_v1 = vld [vmem:[#allocation5 + $0x2cc] sm:$0xf0]  ;;  %v3484_v2 = vld [vmem:[#allocation5 + $0x29c] sm:$0xf] }
  0x32   :  { %955 = vmatpush.bf16.msra.mxu3 %v2680_v24  ;;  %v2944_v3 = vor.u32 %v3483_v59, %v2941_v60  ;;  %v2949_v4 = vld [vmem:[#allocation5 + $0x2d8] sm:$0xf0]  ;;  %v2883_v5 = vld [vmem:[#allocation5 + $0x218] sm:$0xf]  ;;  %v3467_v7 = vld [vmem:[#allocation5 + $0x214] sm:$0xf]  ;;  %v2940_v9 = vor.u32 %v3491_v1, %v2939_v0 }
  0x33   :  { %v3476_v6 = vld [vmem:[#allocation5 + $0x254] sm:$0xf0]  ;;  %v2877_v8 = vld [vmem:[#allocation5 + $0x250] sm:$0xf0]  ;;  %v2875_v10 = vld [vmem:[#allocation5 + $0x210] sm:$0xf]  ;;  %v2952_v11 = vor.u32 %v3484_v2, %v2949_v4 }
  0x34   :  { %899 = vmatpush.bf16.msra.mxu0 %v2604_v31  ;;  %918 = vmatpush.bf16.msra.mxu1 %v2608_v35  ;;  %v2884_v12 = vor.u32 %v3476_v6, %v2883_v5  ;;  %v3475_v13 = vld [vmem:[#allocation5 + $0x24c] sm:$0xf0]  ;;  %v3468_v14 = vld [vmem:[#allocation5 + $0x21c] sm:$0xf]  ;;  %v2880_v16 = vor.u32 %v3467_v7, %v2877_v8  ;;  %v2819_v18 = vld [vmem:[#allocation5 + $0x198] sm:$0xf] }
  0x35   :  { %937 = vmatpush.bf16.msra.mxu2 %v2612_v36  ;;  %v2885_v15 = vld [vmem:[#allocation5 + $0x258] sm:$0xf0]  ;;  %v84_v17 = vld [vmem:[#allocation2 + $0x10] sm:$0xff]  ;;  %v3460_v19 = vld [vmem:[#allocation5 + $0x1d4] sm:$0xf0]  ;;  %v2876_v23 = vor.u32 %v3475_v13, %v2875_v10 }
  0x36   :  { %956 = vmatpush.bf16.msra.mxu3 %v2616_v37  ;;  %v85_v20 = vld [vmem:[#allocation2 + $0x18] sm:$0xff]  ;;  %v3451_v21 = vld [vmem:[#allocation5 + $0x194] sm:$0xf]  ;;  %v2888_v24 = vor.u32 %v3468_v14, %v2885_v15  ;;  %v2820_v25 = vor.u32 %v3460_v19, %v2819_v18  ;;  %v2811_v26 = vld [vmem:[#allocation5 + $0x190] sm:$0xf] }
  0x37   :  { %900 = vmatmul.bf16.vlgmr.msra.gmra.mxu0 %v3915_v42  ;;  %919 = vmatmul.bf16.vlgmr.msra.gmra.mxu1 %v3915_v42  ;;  %v2813_v22 = vld [vmem:[#allocation5 + $0x1d0] sm:$0xf0]  ;;  %v3459_v27 = vld [vmem:[#allocation5 + $0x1cc] sm:$0xf0]  ;;  %v3452_v28 = vld [vmem:[#allocation5 + $0x19c] sm:$0xf]  ;;  %v3921_v29 = vpack.c.bf16 %v85_v20, %v84_v17 }
  0x38   :  { %987 = vmatpush.bf16.msrb.mxu1 %v3072_v43  ;;  %938 = vmatmul.bf16.vlgmr.msra.gmra.mxu2 %v3915_v42  ;;  %v2816_v30 = vor.u32 %v3451_v21, %v2813_v22  ;;  %v2821_v31 = vld [vmem:[#allocation5 + $0x1d8] sm:$0xf0]  ;;  %v2755_v32 = vld [vmem:[#allocation5 + $0x118] sm:$0xf]  ;;  %v3435_v34 = vld [vmem:[#allocation5 + $0x114] sm:$0xf]  ;;  %v2812_v36 = vor.u32 %v3459_v27, %v2811_v26 }
  0x39   :  { %1006 = vmatpush.bf16.msrb.mxu2 %v3076_v38  ;;  %957 = vmatmul.bf16.vlgmr.msra.gmra.mxu3 %v3915_v42  ;;  %v3444_v33 = vld [vmem:[#allocation5 + $0x154] sm:$0xf0]  ;;  %v2749_v35 = vld [vmem:[#allocation5 + $0x150] sm:$0xf0]  ;;  %v2824_v37 = vor.u32 %v3452_v28, %v2821_v31  ;;  %v2747_v39 = vld [vmem:[#allocation5 + $0x110] sm:$0xf] }
  0x3a   :  { %968 = vmatpush.bf16.msrb.mxu0 %v3068_v49  ;;  %1025 = vmatpush.bf16.msrb.mxu3 %v3080_v50  ;;  %v2756_v38 = vor.u32 %v3444_v33, %v2755_v32  ;;  %v3443_v40 = vld [vmem:[#allocation5 + $0x14c] sm:$0xf0]  ;;  %v3436_v41 = vld [vmem:[#allocation5 + $0x11c] sm:$0xf]  ;;  %v2752_v43 = vor.u32 %v3435_v34, %v2749_v35  ;;  %v2691_v45 = vld [vmem:[#allocation5 + $0x98] sm:$0xf] }
  0x3b   :  { %v2757_v44 = vld [vmem:[#allocation5 + $0x158] sm:$0xf0]  ;;  %v3428_v46 = vld [vmem:[#allocation5 + $0xd4] sm:$0xf0]  ;;  %v3419_v47 = vld [vmem:[#allocation5 + $0x94] sm:$0xf]  ;;  %v2748_v49 = vor.u32 %v3443_v40, %v2747_v39 }
  0x3c   :  { %988 = vmatpush.bf16.msrb.mxu1 %v3008_v55  ;;  %v2685_v48 = vld [vmem:[#allocation5 + $0xd0] sm:$0xf0]  ;;  %v2683_v50 = vld [vmem:[#allocation5 + $0x90] sm:$0xf]  ;;  %v2692_v52 = vor.u32 %v3428_v46, %v2691_v45  ;;  %v3420_v54 = vld [vmem:[#allocation5 + $0x9c] sm:$0xf] }
  0x3d   :  { %1007 = vmatpush.bf16.msrb.mxu2 %v3012_v51  ;;  %v2760_v51 = vor.u32 %v3436_v41, %v2757_v44  ;;  %v3427_v53 = vld [vmem:[#allocation5 + $0xcc] sm:$0xf0]  ;;  %v2693_v55 = vld [vmem:[#allocation5 + $0xd8] sm:$0xf0]  ;;  %v2688_v56 = vor.u32 %v3419_v47, %v2685_v48  ;;  %v2627_v57 = vld [vmem:[#allocation5 + $0x18] sm:$0xf] }
  0x3e   :  { %969 = vmatpush.bf16.msrb.mxu0 %v3004_v61  ;;  %1026 = vmatpush.bf16.msrb.mxu3 %v3016_v62  ;;  %v3412_v58 = vld [vmem:[#allocation5 + $0x54] sm:$0xf0]  ;;  %v3403_v59 = vld [vmem:[#allocation5 + $0x14] sm:$0xf]  ;;  %v3091_v61 = vld [vmem:[#allocation5 + $0x3a8] sm:$0xf] }
  0x3f   :  { %v2621_v60 = vld [vmem:[#allocation5 + $0x50] sm:$0xf0]  ;;  %v3526_v62 = vld [vmem:[#allocation5 + $0x3e4] sm:$0xf0]  ;;  %v2619_v0 = vld [vmem:[#allocation5 + $0x10] sm:$0xf]  ;;  %v2628_v4 = vor.u32 %v3412_v58, %v2627_v57 }
  0x40   :  { %989 = vmatpush.bf16.msrb.mxu1 %v2944_v3  ;;  %v3517_v1 = vld [vmem:[#allocation5 + $0x3a4] sm:$0xf]  ;;  %v2696_v3 = vor.u32 %v3420_v54, %v2693_v55  ;;  %v3411_v5 = vld [vmem:[#allocation5 + $0x4c] sm:$0xf0]  ;;  %v3404_v6 = vld [vmem:[#allocation5 + $0x1c] sm:$0xf]  ;;  %v2624_v8 = vor.u32 %v3403_v59, %v2621_v60 }
  0x41   :  { %1008 = vmatpush.bf16.msrb.mxu2 %v2948_v63  ;;  %v2684_v63 = vor.u32 %v3427_v53, %v2683_v50  ;;  %v3085_v2 = vld [vmem:[#allocation5 + $0x3e0] sm:$0xf0]  ;;  %v2629_v7 = vld [vmem:[#allocation5 + $0x58] sm:$0xf0]  ;;  %v3083_v10 = vld [vmem:[#allocation5 + $0x3a0] sm:$0xf]  ;;  %v2620_v17 = vor.u32 %v3411_v5, %v2619_v0 }
  0x42   :  { %970 = vmatpush.bf16.msrb.mxu0 %v2940_v9  ;;  %1027 = vmatpush.bf16.msrb.mxu3 %v2952_v11  ;;  %v3092_v9 = vor.u32 %v3526_v62, %v3091_v61  ;;  %v3525_v11 = vld [vmem:[#allocation5 + $0x3dc] sm:$0xf0]  ;;  %v3088_v13 = vor.u32 %v3517_v1, %v3085_v2  ;;  %v3093_v14 = vld [vmem:[#allocation5 + $0x3e8] sm:$0xf0]  ;;  %v3027_v15 = vld [vmem:[#allocation5 + $0x328] sm:$0xf]  ;;  %v2632_v18 = vor.u32 %v3404_v6, %v2629_v7 }
  0x43   :  { %v3084_v19 = vor.u32 %v3525_v11, %v3083_v10  ;;  %v3019_v20 = vld [vmem:[#allocation5 + $0x320] sm:$0xf]  ;;  %v3502_v26 = vld [vmem:[#allocation5 + $0x32c] sm:$0xf]  ;;  %v2963_v28 = vld [vmem:[#allocation5 + $0x2a8] sm:$0xf] }
  0x44   :  { %990 = vmatpush.bf16.msrb.mxu1 %v2880_v16  ;;  %v3510_v16 = vld [vmem:[#allocation5 + $0x364] sm:$0xf0]  ;;  %v3509_v21 = vld [vmem:[#allocation5 + $0x35c] sm:$0xf0]  ;;  %v3029_v27 = vld [vmem:[#allocation5 + $0x368] sm:$0xf0] }
  0x45   :  { %1009 = vmatpush.bf16.msrb.mxu2 %v2884_v12  ;;  %v3518_v12 = vld [vmem:[#allocation5 + $0x3ac] sm:$0xf]  ;;  %v3020_v31 = vor.u32 %v3509_v21, %v3019_v20  ;;  %v2955_v33 = vld [vmem:[#allocation5 + $0x2a0] sm:$0xf]  ;;  %v3032_v35 = vor.u32 %v3502_v26, %v3029_v27  ;;  %v2899_v41 = vld [vmem:[#allocation5 + $0x228] sm:$0xf] }
  0x46   :  { %971 = vmatpush.bf16.msrb.mxu0 %v2876_v23  ;;  %1028 = vmatpush.bf16.msrb.mxu3 %v2888_v24  ;;  %v3096_v22 = vor.u32 %v3518_v12, %v3093_v14  ;;  %v3028_v23 = vor.u32 %v3510_v16, %v3027_v15  ;;  %v3501_v24 = vld [vmem:[#allocation5 + $0x324] sm:$0xf]  ;;  %v3493_v34 = vld [vmem:[#allocation5 + $0x2dc] sm:$0xf0]  ;;  %v3486_v39 = vld [vmem:[#allocation5 + $0x2ac] sm:$0xf] }
  0x47   :  { %905 = vmatmul.bf16.gmra.mxu0 %v3921_v29  ;;  %924 = vmatmul.bf16.gmra.mxu1 %v3921_v29  ;;  %v2965_v40 = vld [vmem:[#allocation5 + $0x2e8] sm:$0xf0]  ;;  %v2956_v44 = vor.u32 %v3493_v34, %v2955_v33  ;;  %v2891_v46 = vld [vmem:[#allocation5 + $0x220] sm:$0xf]  ;;  %v3469_v50 = vld [vmem:[#allocation5 + $0x224] sm:$0xf] }
  0x48   :  { %991 = vmatpush.bf16.msrb.mxu1 %v2816_v30  ;;  %943 = vmatmul.bf16.gmra.mxu2 %v3921_v29  ;;  %v3494_v30 = vld [vmem:[#allocation5 + $0x2e4] sm:$0xf0]  ;;  %v3477_v47 = vld [vmem:[#allocation5 + $0x25c] sm:$0xf0]  ;;  %v2968_v48 = vor.u32 %v3486_v39, %v2965_v40  ;;  %v2901_v53 = vld [vmem:[#allocation5 + $0x268] sm:$0xf0] }
  0x49   :  { %1010 = vmatpush.bf16.msrb.mxu2 %v2820_v25  ;;  %962 = vmatmul.bf16.gmra.mxu3 %v3921_v29  ;;  %v3021_v25 = vld [vmem:[#allocation5 + $0x360] sm:$0xf0]  ;;  %v2835_v54 = vld [vmem:[#allocation5 + $0x1a8] sm:$0xf]  ;;  %v2827_v58 = vld [vmem:[#allocation5 + $0x1a0] sm:$0xf] }
  0x4a   :  { %972 = vmatpush.bf16.msrb.mxu0 %v2812_v36  ;;  %1029 = vmatpush.bf16.msrb.mxu3 %v2824_v37  ;;  %v3024_v32 = vor.u32 %v3501_v24, %v3021_v25  ;;  %v2964_v36 = vor.u32 %v3494_v30, %v2963_v28  ;;  %v3485_v37 = vld [vmem:[#allocation5 + $0x2a4] sm:$0xf]  ;;  %v3462_v55 = vld [vmem:[#allocation5 + $0x1e4] sm:$0xf0]  ;;  %v3461_v59 = vld [vmem:[#allocation5 + $0x1dc] sm:$0xf0] }
  0x4b   :  { %v2836_v61 = vor.u32 %v3462_v55, %v2835_v54  ;;  %v3453_v62 = vld [vmem:[#allocation5 + $0x1a4] sm:$0xf]  ;;  %v3454_v0 = vld [vmem:[#allocation5 + $0x1ac] sm:$0xf]  ;;  %v2771_v2 = vld [vmem:[#allocation5 + $0x128] sm:$0xf] }
  0x4c   :  { %992 = vmatpush.bf16.msrb.mxu1 %v2752_v43  ;;  %v3478_v43 = vld [vmem:[#allocation5 + $0x264] sm:$0xf0]  ;;  %v2837_v1 = vld [vmem:[#allocation5 + $0x1e8] sm:$0xf0]  ;;  %v2763_v6 = vld [vmem:[#allocation5 + $0x120] sm:$0xf] }
  0x4d   :  { %1011 = vmatpush.bf16.msrb.mxu2 %v2756_v38  ;;  %v2957_v38 = vld [vmem:[#allocation5 + $0x2e0] sm:$0xf0]  ;;  %v3445_v7 = vld [vmem:[#allocation5 + $0x15c] sm:$0xf0]  ;;  %v3438_v12 = vld [vmem:[#allocation5 + $0x12c] sm:$0xf] }
  0x4e   :  { %973 = vmatpush.bf16.msrb.mxu0 %v2748_v49  ;;  %1030 = vmatpush.bf16.msrb.mxu3 %v2760_v51  ;;  %v2960_v45 = vor.u32 %v3485_v37, %v2957_v38  ;;  %v2900_v49 = vor.u32 %v3478_v43, %v2899_v41  ;;  %v2893_v51 = vld [vmem:[#allocation5 + $0x260] sm:$0xf0]  ;;  %v2707_v14 = vld [vmem:[#allocation5 + $0xa8] sm:$0xf]  ;;  %v2764_v16 = vor.u32 %v3445_v7, %v2763_v6  ;;  %v3422_v24 = vld [vmem:[#allocation5 + $0xac] sm:$0xf] }
  0x4f   :  { %v2896_v57 = vor.u32 %v3469_v50, %v2893_v51  ;;  %v3437_v10 = vld [vmem:[#allocation5 + $0x124] sm:$0xf]  ;;  %v3430_v15 = vld [vmem:[#allocation5 + $0xe4] sm:$0xf0]  ;;  %v2709_v25 = vld [vmem:[#allocation5 + $0xe8] sm:$0xf0] }
  0x50   :  { %993 = vmatpush.bf16.msrb.mxu1 %v2688_v56  ;;  %v2892_v56 = vor.u32 %v3477_v47, %v2891_v46  ;;  %v2765_v11 = vld [vmem:[#allocation5 + $0x160] sm:$0xf0]  ;;  %v2708_v21 = vor.u32 %v3430_v15, %v2707_v14  ;;  %v2643_v26 = vld [vmem:[#allocation5 + $0x28] sm:$0xf]  ;;  %v3107_v28 = vld [vmem:[#allocation5 + $0x3b8] sm:$0xf] }
  0x51   :  { %1012 = vmatpush.bf16.msrb.mxu2 %v2692_v52  ;;  %v3470_v52 = vld [vmem:[#allocation5 + $0x22c] sm:$0xf]  ;;  %v3414_v27 = vld [vmem:[#allocation5 + $0x64] sm:$0xf0]  ;;  %v3528_v30 = vld [vmem:[#allocation5 + $0x3f4] sm:$0xf0] }
  0x52   :  { %974 = vmatpush.bf16.msrb.mxu0 %v2684_v63  ;;  %1031 = vmatpush.bf16.msrb.mxu3 %v2696_v3  ;;  %v2904_v60 = vor.u32 %v3470_v52, %v2901_v53  ;;  %v2829_v63 = vld [vmem:[#allocation5 + $0x1e0] sm:$0xf0]  ;;  %v3446_v3 = vld [vmem:[#allocation5 + $0x164] sm:$0xf0]  ;;  %v2635_v33 = vld [vmem:[#allocation5 + $0x20] sm:$0xf]  ;;  %v2644_v37 = vor.u32 %v3414_v27, %v2643_v26  ;;  %v3108_v41 = vor.u32 %v3528_v30, %v3107_v28 }
  0x53   :  { %v2832_v5 = vor.u32 %v3453_v62, %v2829_v63  ;;  %v3413_v34 = vld [vmem:[#allocation5 + $0x5c] sm:$0xf0]  ;;  %v2637_v38 = vld [vmem:[#allocation5 + $0x60] sm:$0xf0]  ;;  %v3406_v39 = vld [vmem:[#allocation5 + $0x2c] sm:$0xf] }
  0x54   :  { %994 = vmatpush.bf16.msrb.mxu1 %v2624_v8  ;;  %v2840_v8 = vor.u32 %v3454_v0, %v2837_v1  ;;  %v2645_v40 = vld [vmem:[#allocation5 + $0x68] sm:$0xf0]  ;;  %v3099_v43 = vld [vmem:[#allocation5 + $0x3b0] sm:$0xf]  ;;  %v3101_v46 = vld [vmem:[#allocation5 + $0x3f0] sm:$0xf0] }
  0x55   :  { %1013 = vmatpush.bf16.msrb.mxu2 %v2628_v4  ;;  %v2828_v4 = vor.u32 %v3461_v59, %v2827_v58  ;;  %v3520_v47 = vld [vmem:[#allocation5 + $0x3bc] sm:$0xf]  ;;  %v3043_v51 = vld [vmem:[#allocation5 + $0x338] sm:$0xf]  ;;  %v2648_v53 = vor.u32 %v3406_v39, %v2645_v40  ;;  %v3511_v58 = vld [vmem:[#allocation5 + $0x36c] sm:$0xf0] }
  0x56   :  { %975 = vmatpush.bf16.msrb.mxu0 %v2620_v17  ;;  %1032 = vmatpush.bf16.msrb.mxu3 %v2632_v18  ;;  %v2768_v17 = vor.u32 %v3437_v10, %v2765_v11  ;;  %v2699_v18 = vld [vmem:[#allocation5 + $0xa0] sm:$0xf]  ;;  %v3512_v52 = vld [vmem:[#allocation5 + $0x374] sm:$0xf0]  ;;  %v3504_v63 = vld [vmem:[#allocation5 + $0x33c] sm:$0xf] }
  0x57   :  { %995 = vmatmul.bf16.vlgmr.msrb.gmra.mxu1 %v3915_v42  ;;  %v3044_v59 = vor.u32 %v3512_v52, %v3043_v51  ;;  %v3045_v0 = vld [vmem:[#allocation5 + $0x378] sm:$0xf0]  ;;  %v2979_v1 = vld [vmem:[#allocation5 + $0x2b8] sm:$0xf]  ;;  %v3487_v7 = vld [vmem:[#allocation5 + $0x2b4] sm:$0xf] }
  0x58   :  { %1063 = vmatpush.bf16.msra.mxu1 %v3088_v13  ;;  %1014 = vmatmul.bf16.vlgmr.msrb.gmra.mxu2 %v3915_v42  ;;  %v2773_v13 = vld [vmem:[#allocation5 + $0x168] sm:$0xf0]  ;;  %v3048_v6 = vor.u32 %v3504_v63, %v3045_v0  ;;  %v3488_v11 = vld [vmem:[#allocation5 + $0x2bc] sm:$0xf]  ;;  %v3480_v14 = vld [vmem:[#allocation5 + $0x274] sm:$0xf0] }
  0x59   :  { %1082 = vmatpush.bf16.msra.mxu2 %v3092_v9  ;;  %976 = vmatmul.bf16.vlgmr.msrb.gmra.mxu0 %v3915_v42  ;;  %v2772_v9 = vor.u32 %v3446_v3, %v2771_v2  ;;  %v2776_v20 = vor.u32 %v3438_v12, %v2773_v13  ;;  %v3496_v2 = vld [vmem:[#allocation5 + $0x2f4] sm:$0xf0]  ;;  %v2971_v3 = vld [vmem:[#allocation5 + $0x2b0] sm:$0xf]  ;;  %v2981_v12 = vld [vmem:[#allocation5 + $0x2f8] sm:$0xf0] }
  0x5a   :  { %1044 = vmatpush.bf16.msra.mxu0 %v3084_v19  ;;  %1101 = vmatpush.bf16.msra.mxu3 %v3096_v22  ;;  %v3429_v19 = vld [vmem:[#allocation5 + $0xdc] sm:$0xf0]  ;;  %v3421_v22 = vld [vmem:[#allocation5 + $0xa4] sm:$0xf]  ;;  %v2915_v13 = vld [vmem:[#allocation5 + $0x238] sm:$0xf] }
  0x5b   :  { %1033 = vmatmul.bf16.vlgmr.msrb.gmra.mxu3 %v3915_v42  ;;  %v2907_v15 = vld [vmem:[#allocation5 + $0x230] sm:$0xf]  ;;  %v3464_v26 = vld [vmem:[#allocation5 + $0x1f4] sm:$0xf0] }
  0x5c   :  { %1064 = vmatpush.bf16.msra.mxu1 %v3024_v32  ;;  %v2843_v27 = vld [vmem:[#allocation5 + $0x1b0] sm:$0xf]  ;;  %v3448_v39 = vld [vmem:[#allocation5 + $0x174] sm:$0xf0] }
  0x5d   :  { %1083 = vmatpush.bf16.msra.mxu2 %v3028_v23  ;;  %v2701_v23 = vld [vmem:[#allocation5 + $0xe0] sm:$0xf0]  ;;  %v3463_v28 = vld [vmem:[#allocation5 + $0x1ec] sm:$0xf0]  ;;  %v2723_v51 = vld [vmem:[#allocation5 + $0xb8] sm:$0xf] }
  0x5e   :  { %1045 = vmatpush.bf16.msra.mxu0 %v3020_v31  ;;  %1102 = vmatpush.bf16.msra.mxu3 %v3032_v35  ;;  %v2700_v31 = vor.u32 %v3429_v19, %v2699_v18  ;;  %v2704_v32 = vor.u32 %v3421_v22, %v2701_v23  ;;  %v3405_v35 = vld [vmem:[#allocation5 + $0x24] sm:$0xf]  ;;  %v2984_v18 = vor.u32 %v3488_v11, %v2981_v12  ;;  %v3471_v19 = vld [vmem:[#allocation5 + $0x234] sm:$0xf]  ;;  %v3472_v23 = vld [vmem:[#allocation5 + $0x23c] sm:$0xf] }
  0x5f   :  { %v2640_v50 = vor.u32 %v3405_v35, %v2637_v38  ;;  %v2844_v35 = vor.u32 %v3463_v28, %v2843_v27  ;;  %v2787_v38 = vld [vmem:[#allocation5 + $0x138] sm:$0xf]  ;;  %v2779_v40 = vld [vmem:[#allocation5 + $0x130] sm:$0xf] }
  0x60   :  { %1065 = vmatpush.bf16.msra.mxu1 %v2960_v45  ;;  %v3519_v45 = vld [vmem:[#allocation5 + $0x3b4] sm:$0xf]  ;;  %v3432_v52 = vld [vmem:[#allocation5 + $0xf4] sm:$0xf0] }
  0x61   :  { %1084 = vmatpush.bf16.msra.mxu2 %v2964_v36  ;;  %v2712_v36 = vor.u32 %v3422_v24, %v2709_v25  ;;  %v3104_v55 = vor.u32 %v3519_v45, %v3101_v46  ;;  %v2917_v24 = vld [vmem:[#allocation5 + $0x278] sm:$0xf0]  ;;  %v2851_v25 = vld [vmem:[#allocation5 + $0x1b8] sm:$0xf]  ;;  %v3439_v45 = vld [vmem:[#allocation5 + $0x134] sm:$0xf] }
  0x62   :  { %1046 = vmatpush.bf16.msra.mxu0 %v2956_v44  ;;  %1103 = vmatpush.bf16.msra.mxu3 %v2968_v48  ;;  %v3527_v44 = vld [vmem:[#allocation5 + $0x3ec] sm:$0xf0]  ;;  %v3109_v48 = vld [vmem:[#allocation5 + $0x3f8] sm:$0xf0]  ;;  %v2781_v46 = vld [vmem:[#allocation5 + $0x170] sm:$0xf0] }
  0x63   :  { %v3100_v54 = vor.u32 %v3527_v44, %v3099_v43  ;;  %v2659_v63 = vld [vmem:[#allocation5 + $0x38] sm:$0xf] }
  0x64   :  { %1066 = vmatpush.bf16.msra.mxu1 %v2896_v57  ;;  %v3035_v57 = vld [vmem:[#allocation5 + $0x330] sm:$0xf]  ;;  %v3416_v0 = vld [vmem:[#allocation5 + $0x74] sm:$0xf0] }
  0x65   :  { %1085 = vmatpush.bf16.msra.mxu2 %v2900_v49  ;;  %v2636_v49 = vor.u32 %v3413_v34, %v2635_v33  ;;  %v3036_v62 = vor.u32 %v3511_v58, %v3035_v57  ;;  %v2845_v33 = vld [vmem:[#allocation5 + $0x1f0] sm:$0xf0]  ;;  %v2852_v34 = vor.u32 %v3464_v26, %v2851_v25 }
  0x66   :  { %1047 = vmatpush.bf16.msra.mxu0 %v2892_v56  ;;  %1104 = vmatpush.bf16.msra.mxu3 %v2904_v60  ;;  %v3112_v56 = vor.u32 %v3520_v47, %v3109_v48  ;;  %v3503_v60 = vld [vmem:[#allocation5 + $0x334] sm:$0xf]  ;;  %v2788_v47 = vor.u32 %v3448_v39, %v2787_v38 }
  0x67   :  { %1000 = vmatmul.bf16.gmra.mxu1 %v3921_v29  ;;  %v3423_v57 = vld [vmem:[#allocation5 + $0xb4] sm:$0xf] }
  0x68   :  { %1067 = vmatpush.bf16.msra.mxu1 %v2832_v5  ;;  %1019 = vmatmul.bf16.gmra.mxu2 %v3921_v29  ;;  %v2717_v58 = vld [vmem:[#allocation5 + $0xf0] sm:$0xf0] }
  0x69   :  { %1086 = vmatpush.bf16.msra.mxu2 %v2836_v61  ;;  %981 = vmatmul.bf16.gmra.mxu0 %v3921_v29  ;;  %v3037_v61 = vld [vmem:[#allocation5 + $0x370] sm:$0xf0] }
  0x6a   :  { %1048 = vmatpush.bf16.msra.mxu0 %v2828_v4  ;;  %1105 = vmatpush.bf16.msra.mxu3 %v2840_v8  ;;  %v3495_v4 = vld [vmem:[#allocation5 + $0x2ec] sm:$0xf0]  ;;  %v3040_v5 = vor.u32 %v3503_v60, %v3037_v61  ;;  %v2973_v8 = vld [vmem:[#allocation5 + $0x2f0] sm:$0xf0]  ;;  %v3424_v61 = vld [vmem:[#allocation5 + $0xbc] sm:$0xf] }
  0x6b   :  { %1038 = vmatmul.bf16.gmra.mxu3 %v3921_v29  ;;  %v2972_v10 = vor.u32 %v3495_v4, %v2971_v3  ;;  %v2720_v3 = vor.u32 %v3423_v57, %v2717_v58 }
  0x6c   :  { %1068 = vmatpush.bf16.msra.mxu1 %v2768_v17  ;;  %v2976_v17 = vor.u32 %v3487_v7, %v2973_v8  ;;  %v2653_v8 = vld [vmem:[#allocation5 + $0x70] sm:$0xf0] }
  0x6d   :  { %1087 = vmatpush.bf16.msra.mxu2 %v2772_v9  ;;  %v2980_v9 = vor.u32 %v3496_v2, %v2979_v1  ;;  %v2651_v1 = vld [vmem:[#allocation5 + $0x30] sm:$0xf] }
  0x6e   :  { %1049 = vmatpush.bf16.msra.mxu0 %v2764_v16  ;;  %1106 = vmatpush.bf16.msra.mxu3 %v2776_v20  ;;  %v3479_v16 = vld [vmem:[#allocation5 + $0x26c] sm:$0xf0]  ;;  %v2909_v20 = vld [vmem:[#allocation5 + $0x270] sm:$0xf0] }
  0x6f   :  { %v2908_v22 = vor.u32 %v3479_v16, %v2907_v15  ;;  %v2912_v30 = vor.u32 %v3471_v19, %v2909_v20  ;;  %v3415_v2 = vld [vmem:[#allocation5 + $0x6c] sm:$0xf0] }
  0x70   :  { %1069 = vmatpush.bf16.msra.mxu1 %v2704_v32  ;;  %v3455_v32 = vld [vmem:[#allocation5 + $0x1b4] sm:$0xf]  ;;  %v2652_v7 = vor.u32 %v3415_v2, %v2651_v1 }
  0x71   :  { %1088 = vmatpush.bf16.msra.mxu2 %v2708_v21  ;;  %v2916_v21 = vor.u32 %v3480_v14, %v2915_v13  ;;  %v2848_v43 = vor.u32 %v3455_v32, %v2845_v33  ;;  %v3951_v13 = vld [vmem:[#allocation7] sm:$0xff] }
  0x72   :  { %1050 = vmatpush.bf16.msra.mxu0 %v2700_v31  ;;  %1107 = vmatpush.bf16.msra.mxu3 %v2712_v36  ;;  %v2920_v31 = vor.u32 %v3472_v23, %v2917_v24  ;;  %v3456_v36 = vld [vmem:[#allocation5 + $0x1bc] sm:$0xf]  ;;  %v3954_v14 = vperm.slane %v3951_v13, 0  ;;  %v3957_v16 = vperm.slane %v3951_v13, 1  ;;  %v3968_v20 = vperm.slane %v3951_v13, 2 }
  0x74   :  { %1070 = vmatpush.bf16.msra.mxu1 %v2640_v50  ;;  %v2789_v50 = vld [vmem:[#allocation5 + $0x178] sm:$0xf0] }
  0x75   :  { %1089 = vmatpush.bf16.msra.mxu2 %v2644_v37  ;;  %v2853_v37 = vld [vmem:[#allocation5 + $0x1f8] sm:$0xf0] }
  0x76   :  { %1051 = vmatpush.bf16.msra.mxu0 %v2636_v49  ;;  %1108 = vmatpush.bf16.msra.mxu3 %v2648_v53  ;;  %v2856_v44 = vor.u32 %v3456_v36, %v2853_v37  ;;  %v3440_v49 = vld [vmem:[#allocation5 + $0x13c] sm:$0xf]  ;;  %v2715_v53 = vld [vmem:[#allocation5 + $0xb0] sm:$0xf] }
  0x77   :  { %1071 = vmatmul.bf16.vlgmr.msra.gmra.mxu1 %v3915_v42 }
  0x78   :  { %1139 = vmatpush.bf16.msrb.mxu1 %v3104_v55  ;;  %1090 = vmatmul.bf16.vlgmr.msra.gmra.mxu2 %v3915_v42  ;;  %v2784_v55 = vor.u32 %v3439_v45, %v2781_v46 }
  0x79   :  { %1158 = vmatpush.bf16.msrb.mxu2 %v3108_v41  ;;  %1052 = vmatmul.bf16.vlgmr.msra.gmra.mxu0 %v3915_v42  ;;  %v3447_v41 = vld [vmem:[#allocation5 + $0x16c] sm:$0xf0] }
  0x7a   :  { %1120 = vmatpush.bf16.msrb.mxu0 %v3100_v54  ;;  %1177 = vmatpush.bf16.msrb.mxu3 %v3112_v56  ;;  %v2780_v48 = vor.u32 %v3447_v41, %v2779_v40  ;;  %v3431_v54 = vld [vmem:[#allocation5 + $0xec] sm:$0xf0]  ;;  %v2792_v56 = vor.u32 %v3440_v49, %v2789_v50 }
  0x7b   :  { %1109 = vmatmul.bf16.vlgmr.msra.gmra.mxu3 %v3915_v42  ;;  %v2716_v60 = vor.u32 %v3431_v54, %v2715_v53 }
  0x7c   :  { %1140 = vmatpush.bf16.msrb.mxu1 %v3040_v5  ;;  %v3407_v5 = vld [vmem:[#allocation5 + $0x34] sm:$0xf] }
  0x7d   :  { %1159 = vmatpush.bf16.msrb.mxu2 %v3044_v59  ;;  %v2724_v59 = vor.u32 %v3432_v52, %v2723_v51  ;;  %v2656_v11 = vor.u32 %v3407_v5, %v2653_v8 }
  0x7e   :  { %1121 = vmatpush.bf16.msrb.mxu0 %v3036_v62  ;;  %1178 = vmatpush.bf16.msrb.mxu3 %v3048_v6  ;;  %v2725_v62 = vld [vmem:[#allocation5 + $0xf8] sm:$0xf0]  ;;  %v2660_v6 = vor.u32 %v3416_v0, %v2659_v63 }
  0x7f   :  { %v2728_v4 = vor.u32 %v3424_v61, %v2725_v62 }
  0x80   :  { %1141 = vmatpush.bf16.msrb.mxu1 %v2976_v17 }
  0x81   :  { %1160 = vmatpush.bf16.msrb.mxu2 %v2980_v9  ;;  %v3408_v9 = vld [vmem:[#allocation5 + $0x3c] sm:$0xf] }
  0x82   :  { %1122 = vmatpush.bf16.msrb.mxu0 %v2972_v10  ;;  %1179 = vmatpush.bf16.msrb.mxu3 %v2984_v18  ;;  %v2661_v10 = vld [vmem:[#allocation5 + $0x78] sm:$0xf0] }
  0x83   :  { %v2664_v12 = vor.u32 %v3408_v9, %v2661_v10 }
  0x84   :  { %1142 = vmatpush.bf16.msrb.mxu1 %v2912_v30 }
  0x85   :  { %1161 = vmatpush.bf16.msrb.mxu2 %v2916_v21 }
  0x86   :  { %1123 = vmatpush.bf16.msrb.mxu0 %v2908_v22  ;;  %1180 = vmatpush.bf16.msrb.mxu3 %v2920_v31  ;;  %v3971_v22 = vperm.slane %v3951_v13, 3 }
  0x87   :  { %1076 = vmatmul.bf16.gmra.mxu1 %v3921_v29 }
  0x88   :  { %1143 = vmatpush.bf16.msrb.mxu1 %v2848_v43  ;;  %1095 = vmatmul.bf16.gmra.mxu2 %v3921_v29 }
  0x89   :  { %1162 = vmatpush.bf16.msrb.mxu2 %v2852_v34  ;;  %1057 = vmatmul.bf16.gmra.mxu0 %v3921_v29 }
  0x8a   :  { %1124 = vmatpush.bf16.msrb.mxu0 %v2844_v35  ;;  %1181 = vmatpush.bf16.msrb.mxu3 %v2856_v44 }
  0x8b   :  { %1114 = vmatmul.bf16.gmra.mxu3 %v3921_v29 }
  0x8c   :  { %1144 = vmatpush.bf16.msrb.mxu1 %v2784_v55 }
  0x8d   :  { %1163 = vmatpush.bf16.msrb.mxu2 %v2788_v47 }
  0x8e   :  { %1125 = vmatpush.bf16.msrb.mxu0 %v2780_v48  ;;  %1182 = vmatpush.bf16.msrb.mxu3 %v2792_v56 }
  0x90   :  { %1145 = vmatpush.bf16.msrb.mxu1 %v2720_v3 }
  0x91   :  { %1164 = vmatpush.bf16.msrb.mxu2 %v2724_v59 }
  0x92   :  { %1126 = vmatpush.bf16.msrb.mxu0 %v2716_v60  ;;  %1183 = vmatpush.bf16.msrb.mxu3 %v2728_v4 }
  0x94   :  { %1146 = vmatpush.bf16.msrb.mxu1 %v2656_v11 }
  0x95   :  { %1165 = vmatpush.bf16.msrb.mxu2 %v2660_v6 }
  0x96   :  { %1127 = vmatpush.bf16.msrb.mxu0 %v2652_v7  ;;  %1184 = vmatpush.bf16.msrb.mxu3 %v2664_v12 }
  0x97   :  { %1147 = vmatmul.bf16.vlgmr.msrb.gmra.mxu1 %v3915_v42 }
  0x98   :  { %1166 = vmatmul.bf16.vlgmr.msrb.gmra.mxu2 %v3915_v42 }
  0x99   :  { %1128 = vmatmul.bf16.vlgmr.msrb.gmra.mxu0 %v3915_v42 }
  0x9b   :  { %1185 = vmatmul.bf16.vlgmr.msrb.gmra.mxu3 %v3915_v42 }
  0xa7   :  { %1152 = vmatmul.bf16.gmra.mxu1 %v3921_v29 }
  0xa8   :  { %1171 = vmatmul.bf16.gmra.mxu2 %v3921_v29 }
  0xa9   :  { %1133 = vmatmul.bf16.gmra.mxu0 %v3921_v29 }
  0xab   :  { %1190 = vmatmul.bf16.gmra.mxu3 %v3921_v29 }
  0xb4   :  { %v901_v15 = vpop.f32.mrf.mxu0  ;;  %v920_v17 = vpop.f32.mrf.mxu1 }
  0xb5   :  { %v3960_v42 = vadd.f32 %v901_v15, %v3954_v14  ;;  %v3963_v18 = vadd.f32 %v920_v17, %v3957_v16 }
  0xb7   :  { %v3113_v19 = vmul.f32 -1.442695, %v3960_v42  ;;  %v3114_v29 = vmul.f32 -1.442695, %v3963_v18 }
  0xb9   :  { %3604 = vpow2.f32 %v3113_v19 }
  0xba   :  { %3606 = vpow2.f32 %v3114_v29 }
  0xbb   :  { %v939_v21 = vpop.f32.mrf.mxu2 }
  0xbc   :  { %v958_v23 = vpop.f32.mrf.mxu3  ;;  %v3974_v24 = vadd.f32 %v939_v21, %v3968_v20  ;;  %v903_v26 = vpop.f32.mrf.mxu0 }
  0xbd   :  { %v3977_v25 = vadd.f32 %v958_v23, %v3971_v22  ;;  %v3981_v31 = vadd.f32 %v903_v26, %v3954_v14  ;;  %v922_v33 = vpop.f32.mrf.mxu1 }
  0xbe   :  { %v3115_v30 = vmul.f32 -1.442695, %v3974_v24  ;;  %v3990_v37 = vadd.f32 %v922_v33, %v3957_v16 }
  0xbf   :  { %v3605_v27 = vpop.eup %3604  ;;  %v3116_v32 = vmul.f32 -1.442695, %v3977_v25  ;;  %v3121_v36 = vmul.f32 -1.442695, %v3981_v31 }
  0xc0   :  { %v3607_v28 = vpop.eup %3606  ;;  %v3984_v34 = vadd.f32 1.0, %v3605_v27  ;;  %3608 = vpow2.f32 %v3115_v30  ;;  %v3122_v39 = vmul.f32 -1.442695, %v3990_v37 }
  0xc1   :  { %v3986_v35 = vadd.f32 1.0, %v3607_v28  ;;  %3610 = vpow2.f32 %v3116_v32 }
  0xc2   :  { %3612 = vrcp.f32 %v3984_v34  ;;  %v1333_v3 = vand.u32 2147483647, %v3984_v34  ;;  %vm1329_vm0 = vweird.f32 %v3984_v34  ;;  %v1335_v12 = vand.u32 2147483648, %v3984_v34 }
  0xc3   :  { %v941_v38 = vpop.f32.mrf.mxu2  ;;  %3614 = vrcp.f32 %v3986_v35  ;;  %vm1344_vm1 = vweird.f32 %v3986_v35  ;;  %v1348_v19 = vand.u32 2147483647, %v3986_v35  ;;  %v1350_v29 = vand.u32 2147483648, %v3986_v35 }
  0xc4   :  { %3616 = vpow2.f32 %v3121_v36  ;;  %v3996_v40 = vadd.f32 %v941_v38, %v3968_v20  ;;  %v960_v46 = vpop.f32.mrf.mxu3  ;;  %v906_v51 = vpop.f32.mrf.mxu0  ;;  %vm4051_vm3 = vcmp.eq.f32.partialorder %v1333_v3, 8.507059e+37  ;;  %v1336_v36 = vor.u32 1.1754944e-38, %v1335_v12 }
  0xc5   :  { %3618 = vpow2.f32 %v3122_v39  ;;  %v4006_v50 = vadd.f32 %v960_v46, %v3971_v22  ;;  %v4018_v57 = vadd.f32 %v906_v51, %v3954_v14  ;;  %v925_v59 = vpop.f32.mrf.mxu1  ;;  %vm4082_vm7 = vcmp.eq.f32.partialorder %v1348_v19, 8.507059e+37 }
  0xc6   :  { %v3609_v41 = vpop.eup %3608  ;;  %v3123_v45 = vmul.f32 -1.442695, %v3996_v40  ;;  %v4027_v1 = vadd.f32 %v925_v59, %v3957_v16  ;;  %v1351_v46 = vor.u32 1.1754944e-38, %v1350_v29 }
  0xc7   :  { %v3611_v43 = vpop.eup %3610  ;;  %v4003_v48 = vadd.f32 1.0, %v3609_v41  ;;  %v3124_v58 = vmul.f32 -1.442695, %v4006_v50  ;;  %v3129_v0 = vmul.f32 -1.442695, %v4018_v57 }
  0xc8   :  { %v3998_v44 = vpop.eup %3612  ;;  %v4008_v52 = vadd.f32 1.0, %v3611_v43  ;;  %3620 = vpow2.f32 %v3123_v45  ;;  %v3130_v10 = vmul.f32 -1.442695, %v4027_v1 }
  0xc9   :  { %v4001_v47 = vpop.eup %3614  ;;  %v1325_v53 = vmul.f32 %v3998_v44, %v3984_v34  ;;  %3622 = vrcp.f32 %v4003_v48  ;;  %vm1330_vm2 = vweird.f32 %v3998_v44  ;;  %v1365_v38 = vand.u32 2147483648, %v4003_v48 }
  0xca   :  { %v3617_v49 = vpop.eup %3616  ;;  %v1340_v54 = vmul.f32 %v4001_v47, %v3986_v35  ;;  %3624 = vrcp.f32 %v4008_v52  ;;  %vm1345_vm4 = vweird.f32 %v4001_v47  ;;  %vm4069_vm5 = vmor %vm1329_vm0, %vm1330_vm2  ;;  %v1380_v39 = vand.u32 2147483648, %v4008_v52 }
  0xcb   :  { %v4015_v55 = vadd.f32 1.0, %v3617_v49  ;;  %v3619_v56 = vpop.eup %3618  ;;  %v1326_v60 = vsub.f32 1.0, %v1325_v53  ;;  %v944_v4 = vpop.f32.mrf.mxu2  ;;  %vm4078_vm6 = vmor %vm1344_vm1, %vm1345_vm4  ;;  %v1363_v49 = vand.u32 2147483647, %v4003_v48  ;;  %vm1359_vm8 = vweird.f32 %v4003_v48 }
  0xcc   :  { %v1341_v61 = vsub.f32 1.0, %v1340_v54  ;;  %v4023_v62 = vadd.f32 1.0, %v3619_v56  ;;  %v4048_v15 = vadd.f32 %v944_v4, %v3968_v20  ;;  %v1378_v54 = vand.u32 2147483647, %v4008_v52  ;;  %v963_v56 = vpop.f32.mrf.mxu3 }
  0xcd   :  { %3626 = vrcp.f32 %v4015_v55  ;;  %v1327_v5 = vmul.f32 %v3998_v44, %v1326_v60  ;;  %vm4106_vm9 = vcmp.eq.f32.partialorder %v1363_v49, 8.507059e+37  ;;  %vm1374_vm10 = vweird.f32 %v4008_v52 }
  0xce   :  { %v3621_v63 = vpop.eup %3620  ;;  %3628 = vpow2.f32 %v3124_v58  ;;  %v1342_v6 = vmul.f32 %v4001_v47, %v1341_v61  ;;  %v3131_v41 = vmul.f32 -1.442695, %v4048_v15  ;;  %vm1449_vm12 = vweird.f32 %v4015_v55 }
  0xcf   :  { %v4029_v2 = vpop.eup %3622  ;;  %3630 = vrcp.f32 %v4023_v62  ;;  %v4035_v7 = vadd.f32 1.0, %v3621_v63  ;;  %v1328_v23 = vadd.f32 %v3998_v44, %v1327_v5  ;;  %v1470_v29 = vand.u32 2147483648, %v4023_v62 }
  0xd0   :  { %v4037_v8 = vpop.eup %3624  ;;  %v1355_v9 = vmul.f32 %v4029_v2, %v4003_v48  ;;  %3632 = vpow2.f32 %v3129_v0  ;;  %v1343_v26 = vadd.f32 %v4001_v47, %v1342_v6  ;;  %v1366_v0 = vor.u32 1.1754944e-38, %v1365_v38 }
  0xd1   :  { %3634 = vrcp.f32 %v4035_v7  ;;  %v1370_v28 = vmul.f32 %v4037_v8, %v4008_v52  ;;  %v1332_v53 = vsel %vm4069_vm5, %v3998_v44, %v1328_v23  ;;  %v4102_v44 = vor.u32 1.1754944e-38, %v1380_v39 }
  0xd2   :  { %v1356_v27 = vsub.f32 1.0, %v1355_v9  ;;  %3636 = vpow2.f32 %v3130_v10  ;;  %v1347_v35 = vsel %vm4078_vm6, %v4001_v47, %v1343_v26  ;;  %v908_v47 = vpop.f32.mrf.mxu0  ;;  %v1453_v6 = vand.u32 2147483647, %v4015_v55 }
  0xd3   :  { %v4042_v11 = vpop.eup %3626  ;;  %v1371_v59 = vsub.f32 1.0, %v1370_v28  ;;  %3638 = vpow2.f32 %v3131_v41  ;;  %v1455_v9 = vand.u32 2147483648, %v4015_v55  ;;  %v4115_v10 = vadd.f32 %v963_v56, %v3971_v22  ;;  %v927_v28 = vpop.f32.mrf.mxu1  ;;  %v3536_v56 = vld [vmem:[#allocation8 + $0x38] sm:$0xff] }
  0xd4   :  { %v3629_v21 = vpop.eup %3628  ;;  %v1445_v30 = vmul.f32 %v4042_v11, %v4015_v55  ;;  %v1357_v58 = vmul.f32 %v4029_v2, %v1356_v27  ;;  %v1337_v12 = vsel %vm4051_vm3, %v1336_v36, %v1332_v53  ;;  %v1352_v19 = vsel %vm4082_vm7, %v1351_v46, %v1347_v35  ;;  %v946_v34 = vpop.f32.mrf.mxu2  ;;  %2396 = vmatpush.bf16.msra.mxu0 %v3536_v56 }
  0xd5   :  { %v4065_v32 = vpop.eup %3630  ;;  %v4087_v51 = vadd.f32 1.0, %v3629_v21  ;;  %vm1360_vm11 = vweird.f32 %v4029_v2  ;;  %v1372_v23 = vmul.f32 %v4037_v8, %v1371_v59  ;;  %v4133_v33 = vadd.f32 %v908_v47, %v3954_v14  ;;  %v3552_v14 = vld [vmem:[#allocation8 + $0xb8] sm:$0xff] }
  0xd6   :  { %v3633_v43 = vpop.eup %3632  ;;  %v1446_v60 = vsub.f32 1.0, %v1445_v30  ;;  %v1460_v61 = vmul.f32 %v4065_v32, %v4023_v62  ;;  %v1358_v21 = vadd.f32 %v4029_v2, %v1357_v58  ;;  %v4136_v36 = vmul.f32 %v1337_v12, %v3960_v42  ;;  %vm4149_vm14 = vmor %vm1359_vm8, %vm1360_vm11  ;;  %2434 = vmatpush.bf16.msra.mxu2 %v3552_v14 }
  0xd7   :  { %v4100_v63 = vpop.eup %3634  ;;  %v4104_v3 = vadd.f32 1.0, %v3633_v43  ;;  %3640 = vrcp.f32 %v4087_v51  ;;  %vm1375_vm13 = vweird.f32 %v4037_v8  ;;  %v4139_v38 = vor.u32 1.1754944e-38, %v1455_v9 }
  0xd8   :  { %v3637_v4 = vpop.eup %3636  ;;  %v1447_v26 = vmul.f32 %v4042_v11, %v1446_v60  ;;  %v1461_v27 = vsub.f32 1.0, %v1460_v61  ;;  %v1475_v17 = vmul.f32 %v4100_v63, %v4035_v7  ;;  %v3132_v39 = vmul.f32 -1.442695, %v4115_v10  ;;  %vm4195_vm3 = vmor %vm1374_vm10, %vm1375_vm13 }
  0xd9   :  { %3642 = vrcp.f32 %v4104_v3  ;;  %v4130_v30 = vadd.f32 1.0, %v3637_v4  ;;  %v3639_v41 = vpop.eup %3638  ;;  %v4143_v43 = vmul.f32 %v1352_v19, %v3963_v18  ;;  %vm4153_vm15 = vcmp.eq.f32.partialorder %v1378_v54, 8.507059e+37 }
  0xda   :  { %vm1450_vm0 = vweird.f32 %v4042_v11  ;;  %vm1464_vm1 = vweird.f32 %v4023_v62  ;;  %v1468_v45 = vand.u32 2147483647, %v4023_v62  ;;  %v4161_v18 = vadd.f32 %v927_v28, %v3957_v16  ;;  %v3544_v16 = vld [vmem:[#allocation8 + $0x78] sm:$0xff] }
  0xdb   :  { %5387 = vst [vmem:[#allocation15_spill] sm:$0xff] %v4143_v43  ;;  %v1362_v48 = vsel %vm4149_vm14, %v4029_v2, %v1358_v21  ;;  %v1373_v49 = vadd.f32 %v4037_v8, %v1372_v23  ;;  %v1448_v53 = vadd.f32 %v4042_v11, %v1447_v26  ;;  %vm4170_vm2 = vcmp.eq.f32.partialorder %v1453_v6, 8.507059e+37  ;;  %v965_v2 = vpop.f32.mrf.mxu3  ;;  %2415 = vmatpush.bf16.msra.mxu1 %v3544_v16  ;;  %vm4210_vm5 = vmor %vm1449_vm12, %vm1450_vm0 }
  0xdc   :  { %v4174_v54 = vor.u32 1.1754944e-38, %v1470_v29  ;;  %v1462_v58 = vmul.f32 %v4065_v32, %v1461_v27  ;;  %v1476_v59 = vsub.f32 1.0, %v1475_v17  ;;  %3644 = vrcp.f32 %v4130_v30  ;;  %v977_v29 = vpop.f32.mrf.mxu0  ;;  %v3543_v27 = vld [vmem:[#allocation8 + $0x70] sm:$0xff] }
  0xdd   :  { %v4163_v46 = vpop.eup %3640  ;;  %v3137_v60 = vmul.f32 -1.442695, %v4133_v33  ;;  %v4179_v61 = vadd.f32 1.0, %v3639_v41  ;;  %3646 = vpow2.f32 %v3132_v39  ;;  %v4182_v47 = vadd.f32 %v946_v34, %v3968_v20 }
  0xde   :  { %v4185_v4 = vperm.slane %v3951_v13, 4  ;;  %v1367_v9 = vsel %vm4106_vm9, %v1366_v0, %v1362_v48  ;;  %vm1465_vm4 = vweird.f32 %v4065_v32  ;;  %v1490_v20 = vmul.f32 %v4163_v46, %v4087_v51 }
  0xdf   :  { %v4187_v6 = vpop.eup %3642  ;;  %v3138_v19 = vmul.f32 -1.442695, %v4161_v18  ;;  %v1377_v0 = vsel %vm4195_vm3, %v4037_v8, %v1373_v49  ;;  %vm4214_vm6 = vcmp.eq.f32.partialorder %v1468_v45, 8.507059e+37  ;;  %v1483_v21 = vand.u32 2147483647, %v4035_v7  ;;  %v3535_v8 = vld [vmem:[#allocation8 + $0x30] sm:$0xff]  ;;  %2416 = vmatpush.bf16.msra.mxu1 %v3543_v27  ;;  %vm4248_vm8 = vmor %vm1464_vm1, %vm1465_vm4 }
  0xe0   :  { %v1485_v23 = vand.u32 2147483648, %v4035_v7  ;;  %v4221_v26 = vadd.f32 %v965_v2, %v3971_v22  ;;  %v1452_v55 = vsel %vm4210_vm5, %v4042_v11, %v1448_v53  ;;  %v1463_v28 = vadd.f32 %v4065_v32, %v1462_v58  ;;  %2397 = vmatpush.bf16.msra.mxu0 %v3535_v8  ;;  %v3560_v53 = vld [vmem:[#allocation8 + $0xf8] sm:$0xff]  ;;  %v3559_v8 = vld [vmem:[#allocation8 + $0xf0] sm:$0xff] }
  0xe1   :  { %v1477_v17 = vmul.f32 %v4100_v63, %v1476_v59  ;;  %3648 = vpow2.f32 %v3137_v60  ;;  %v1565_v39 = vmul.f32 %v4187_v6, %v4104_v3  ;;  %v3139_v41 = vmul.f32 -1.442695, %v4182_v47  ;;  %v996_v59 = vpop.f32.mrf.mxu1  ;;  %2453 = vmatpush.bf16.msra.mxu3 %v3560_v53 }
  0xe2   :  { %3650 = vrcp.f32 %v4179_v61  ;;  %v4233_v22 = vadd.f32 %v977_v29, %v4185_v4  ;;  %v4235_v45 = vpop.eup %3644  ;;  %v4238_v11 = vmul.f32 %v1367_v9, %v3974_v24  ;;  %vm1479_vm7 = vweird.f32 %v4035_v7 }
  0xe3   :  { %v1491_v34 = vsub.f32 1.0, %v1490_v20  ;;  %3652 = vpow2.f32 %v3138_v19  ;;  %v3647_v48 = vpop.eup %3646  ;;  %v1382_v49 = vsel %vm4153_vm15, %v4102_v44, %v1377_v0  ;;  %v1486_v56 = vor.u32 1.1754944e-38, %v1485_v23  ;;  %v1034_v5 = vpop.f32.mrf.mxu3 }
  0xe4   :  { %5400 = vst [vmem:[#allocation16_spill] sm:$0xff] %v4238_v11  ;;  %v1500_v24 = vand.u32 2147483648, %v4087_v51  ;;  %v3140_v16 = vmul.f32 -1.442695, %v4221_v26  ;;  %v1457_v58 = vsel %vm4170_vm2, %v4139_v38, %v1452_v55  ;;  %v1467_v44 = vsel %vm4248_vm8, %v4065_v32, %v1463_v28  ;;  %v1015_v55 = vpop.f32.mrf.mxu2 }
  0xe5   :  { %vm1480_vm9 = vweird.f32 %v4100_v63  ;;  %vm4261_vm10 = vcmp.eq.f32.partialorder %v1483_v21, 8.507059e+37  ;;  %v1498_v42 = vand.u32 2147483647, %v4087_v51  ;;  %v1478_v60 = vadd.f32 %v4100_v63, %v1477_v17  ;;  %2454 = vmatpush.bf16.msra.mxu3 %v3559_v8 }
  0xe6   :  { %v1566_v2 = vsub.f32 1.0, %v1565_v39  ;;  %3654 = vpow2.f32 %v3139_v41  ;;  %v3117_v35 = vmul.f32 -1.442695, %v4233_v22  ;;  %v4269_v9 = vmul.f32 %v1382_v49, %v3977_v25  ;;  %vm4292_vm12 = vmor %vm1479_vm7, %vm1480_vm9  ;;  %v979_v49 = vpop.f32.mrf.mxu0 }
  0xe7   :  { %v3649_v38 = vpop.eup %3648  ;;  %v1492_v32 = vmul.f32 %v4163_v46, %v1491_v34  ;;  %v1580_v12 = vmul.f32 %v4235_v45, %v4130_v30  ;;  %v4274_v20 = vadd.f32 1.0, %v3647_v48  ;;  %vm1494_vm11 = vweird.f32 %v4087_v51 }
  0xe8   :  { %5405 = vst [vmem:[#allocation17_spill] sm:$0xff] %v4269_v9  ;;  %v4276_v19 = vpop.eup %3650  ;;  %v1501_v29 = vor.u32 1.1754944e-38, %v1500_v24  ;;  %3656 = vpow2.f32 %v3140_v16  ;;  %v4280_v0 = vperm.slane %v3951_v13, 5  ;;  %v4283_v25 = vmul.f32 %v1457_v58, %v3981_v31  ;;  %v3540_v9 = vld [vmem:[#allocation8 + $0x58] sm:$0xff] }
  0xe9   :  { %v3653_v52 = vpop.eup %3652  ;;  %v1472_v21 = vsel %vm4214_vm6, %v4174_v54, %v1467_v44  ;;  %vm4296_vm13 = vcmp.eq.f32.partialorder %v1498_v42, 8.507059e+37  ;;  %v1573_v27 = vand.u32 2147483647, %v4104_v3  ;;  %v1575_v31 = vand.u32 2147483648, %v4104_v3  ;;  %v4354_v62 = vpop.f32.mrf.mxu1 }
  0xea   :  { %v1482_v54 = vsel %vm4292_vm12, %v4100_v63, %v1478_v60  ;;  %vm1495_vm14 = vweird.f32 %v4163_v46  ;;  %v1567_v7 = vmul.f32 %v4187_v6, %v1566_v2  ;;  %3658 = vpow2.f32 %v3117_v35 }
  0xeb   :  { %v1493_v28 = vadd.f32 %v4163_v46, %v1492_v32  ;;  %v1581_v17 = vsub.f32 1.0, %v1580_v12  ;;  %3660 = vrcp.f32 %v4274_v20  ;;  %v4309_v39 = vadd.f32 1.0, %v3649_v38  ;;  %vm4336_vm0 = vmor %vm1494_vm11, %vm1495_vm14 }
  0xec   :  { %v3655_v41 = vpop.eup %3654  ;;  %v1595_v14 = vmul.f32 %v4276_v19, %v4179_v61  ;;  %v4313_v34 = vadd.f32 1.0, %v3653_v52  ;;  %v4316_v63 = vadd.f32 %v996_v59, %v4280_v0  ;;  %v4319_v48 = vperm.slane %v3951_v13, 6 }
  0xed   :  { %v4322_v24 = vmul.f32 %v1472_v21, %v3990_v37  ;;  %vm1569_vm15 = vweird.f32 %v4104_v3  ;;  %v4325_v16 = vor.u32 1.1754944e-38, %v1575_v31  ;;  %v4328_v58 = vperm.slane %v3951_v13, 7  ;;  %v3534_v31 = vld [vmem:[#allocation8 + $0x28] sm:$0xff] }
  0xee   :  { %v3657_v44 = vpop.eup %3656  ;;  %v1487_v42 = vsel %vm4261_vm10, %v1486_v56, %v1482_v54  ;;  %v1568_v37 = vadd.f32 %v4187_v6, %v1567_v7  ;;  %vm1570_vm1 = vweird.f32 %v4187_v6  ;;  %vm4342_vm2 = vcmp.eq.f32.partialorder %v1573_v27, 8.507059e+37  ;;  %2398 = vmatpush.bf16.msra.mxu0 %v3534_v31  ;;  %v3550_v31 = vld [vmem:[#allocation8 + $0xa8] sm:$0xff] }
  0xef   :  { %5410 = vst [vmem:[#allocation18_spill] sm:$0xff] %v4322_v24  ;;  %vm1584_vm3 = vweird.f32 %v4130_v30  ;;  %v1497_v13 = vsel %vm4336_vm0, %v4163_v46, %v1493_v28  ;;  %v1582_v51 = vmul.f32 %v4235_v45, %v1581_v17  ;;  %3662 = vrcp.f32 %v4309_v39  ;;  %vm4367_vm4 = vmor %vm1569_vm15, %vm1570_vm1 }
  0xf0   :  { %v4352_v56 = vadd.f32 1.0, %v3655_v41  ;;  %v3659_v2 = vpop.eup %3658  ;;  %v1596_v35 = vsub.f32 1.0, %v1595_v14  ;;  %3664 = vrcp.f32 %v4313_v34  ;;  %v3118_v38 = vmul.f32 -1.442695, %v4316_v63 }
  0xf1   :  { %v4359_v32 = vadd.f32 %v1015_v55, %v4319_v48  ;;  %v4361_v12 = vpop.eup %3660  ;;  %v1588_v52 = vand.u32 2147483647, %v4130_v30  ;;  %v1590_v21 = vand.u32 2147483648, %v4130_v30  ;;  %v4373_v23 = vadd.f32 1.0, %v3657_v44  ;;  %v3542_v55 = vld [vmem:[#allocation8 + $0x68] sm:$0xff] }
  0xf2   :  { %v4376_v27 = vadd.f32 %v1034_v5, %v4328_v58  ;;  %v4379_v54 = vmul.f32 %v1487_v42, %v3996_v40  ;;  %v1502_v3 = vsel %vm4296_vm13, %v1501_v29, %v1497_v13  ;;  %v1572_v7 = vsel %vm4367_vm4, %v4187_v6, %v1568_v37  ;;  %v4394_v40 = vpop.f32.mrf.mxu2  ;;  %2417 = vmatpush.bf16.msra.mxu1 %v3542_v55  ;;  %v3551_v29 = vld [vmem:[#allocation8 + $0xb0] sm:$0xff]  ;;  %v3533_v37 = vld [vmem:[#allocation8 + $0x20] sm:$0xff] }
  0xf3   :  { %v4387_v28 = vadd.f32 %v979_v49, %v4185_v4  ;;  %v1583_v17 = vadd.f32 %v4235_v45, %v1582_v51  ;;  %vm1585_vm5 = vweird.f32 %v4235_v45  ;;  %3666 = vrcp.f32 %v4352_v56  ;;  %v4400_v49 = vpop.f32.mrf.mxu3  ;;  %2435 = vmatpush.bf16.msra.mxu2 %v3551_v29  ;;  %v3541_v13 = vld [vmem:[#allocation8 + $0x60] sm:$0xff]  ;;  %2399 = vmatpush.bf16.msra.mxu0 %v3533_v37 }
  0xf4   :  { %5417 = vst [vmem:[#allocation19_spill] sm:$0xff] %v4379_v54  ;;  %v4392_v5 = vadd.f32 1.0, %v3659_v2  ;;  %v1597_v41 = vmul.f32 %v4276_v19, %v1596_v35  ;;  %v1610_v6 = vmul.f32 %v4361_v12, %v4274_v20  ;;  %3668 = vpow2.f32 %v3118_v38  ;;  %vm4419_vm7 = vmor %vm1584_vm3, %vm1585_vm5 }
  0xf5   :  { %v3119_v14 = vmul.f32 -1.442695, %v4359_v32  ;;  %v4402_v53 = vpop.eup %3662  ;;  %vm4404_vm6 = vcmp.eq.f32.partialorder %v1588_v52, 8.507059e+37  ;;  %v1591_v42 = vor.u32 1.1754944e-38, %v1590_v21  ;;  %3670 = vrcp.f32 %v4373_v23  ;;  %v4426_v21 = vpop.f32.mrf.mxu0 }
  0xf6   :  { %v3120_v59 = vmul.f32 -1.442695, %v4376_v27  ;;  %v4410_v51 = vpop.eup %3664  ;;  %v4413_v2 = vmul.f32 %v1502_v3, %v4006_v50  ;;  %v1603_v38 = vand.u32 2147483647, %v4179_v61  ;;  %v1605_v46 = vand.u32 2147483648, %v4179_v61  ;;  %2418 = vmatpush.bf16.msra.mxu1 %v3541_v13 }
  0xf7   :  { %v3125_v52 = vmul.f32 -1.442695, %v4387_v28  ;;  %v1577_v50 = vsel %vm4342_vm2, %v4325_v16, %v1572_v7  ;;  %v1587_v30 = vsel %vm4419_vm7, %v4235_v45, %v1583_v17  ;;  %vm1600_vm8 = vweird.f32 %v4276_v19  ;;  %v4445_v7 = vpop.f32.mrf.mxu1  ;;  %2436 = vmatpush.bf16.msra.mxu2 %v3550_v31 }
  0xf8   :  { %5420 = vst [vmem:[#allocation20_spill] sm:$0xff] %v4413_v2  ;;  %3672 = vrcp.f32 %v4392_v5  ;;  %v1598_v55 = vadd.f32 %v4276_v19, %v1597_v41  ;;  %v1611_v3 = vsub.f32 1.0, %v1610_v6  ;;  %v1685_v29 = vmul.f32 %v4402_v53, %v4309_v39 }
  0xf9   :  { %3674 = vpow2.f32 %v3119_v14  ;;  %v4439_v60 = vpop.eup %3666  ;;  %vm1599_vm9 = vweird.f32 %v4179_v61  ;;  %v1620_v45 = vand.u32 2147483648, %v4274_v20  ;;  %v1700_v16 = vmul.f32 %v4410_v51, %v4313_v34 }
  0xfa   :  { %3676 = vpow2.f32 %v3120_v59  ;;  %v3669_v17 = vpop.eup %3668  ;;  %v4448_v8 = vmul.f32 %v1577_v50, %v4018_v57  ;;  %vm4450_vm10 = vcmp.eq.f32.partialorder %v1603_v38, 8.507059e+37  ;;  %v1606_v6 = vor.u32 1.1754944e-38, %v1605_v46  ;;  %vm4460_vm11 = vmor %vm1599_vm9, %vm1600_vm8  ;;  %v3558_v46 = vld [vmem:[#allocation8 + $0xe8] sm:$0xff]  ;;  %v4484_v59 = vpop.f32.mrf.mxu2  ;;  %2419 = vmatpush.bf16.msra.mxu1 %v3540_v9 }
  0xfb   :  { %3678 = vpow2.f32 %v3125_v52  ;;  %v4454_v61 = vpop.eup %3670  ;;  %v1592_v14 = vsel %vm4404_vm6, %v1591_v42, %v1587_v30  ;;  %vm1614_vm12 = vweird.f32 %v4274_v20  ;;  %v1618_v57 = vand.u32 2147483647, %v4274_v20  ;;  %2455 = vmatpush.bf16.msra.mxu3 %v3558_v46 }
  0xfc   :  { %5423 = vst [vmem:[#allocation21_spill] sm:$0xff] %v4448_v8  ;;  %v1695_v37 = vand.u32 2147483648, %v4309_v39  ;;  %v1710_v13 = vand.u32 2147483648, %v4313_v34  ;;  %v1602_v35 = vsel %vm4460_vm11, %v4276_v19, %v1598_v55  ;;  %v1612_v44 = vmul.f32 %v4361_v12, %v1611_v3 }
  0xfd   :  { %v1686_v42 = vsub.f32 1.0, %v1685_v29  ;;  %v4474_v38 = vadd.f32 %v4354_v62, %v4280_v0  ;;  %v4478_v50 = vor.u32 1.1754944e-38, %v1620_v45  ;;  %v1701_v30 = vsub.f32 1.0, %v1700_v16  ;;  %v4494_v45 = vpop.f32.mrf.mxu3  ;;  %v3532_v16 = vld [vmem:[#allocation8 + $0x18] sm:$0xff] }
  0xfe   :  { %v4476_v52 = vpop.eup %3672  ;;  %v1715_v31 = vmul.f32 %v4439_v60, %v4352_v56  ;;  %v4482_v8 = vadd.f32 1.0, %v3669_v17  ;;  %v4487_v55 = vmul.f32 %v1592_v14, %v4027_v1  ;;  %vm1689_vm13 = vweird.f32 %v4309_v39  ;;  %2400 = vmatpush.bf16.msra.mxu0 %v3532_v16  ;;  %v3531_v16 = vld [vmem:[#allocation8 + $0x10] sm:$0xff] }
  0xff   :  { %5428 = vst [vmem:[#allocation22_spill] sm:$0xff] %v4474_v38  ;;  %v3675_v19 = vpop.eup %3674  ;;  %v1693_v62 = vand.u32 2147483647, %v4309_v39  ;;  %v1708_v3 = vand.u32 2147483647, %v4313_v34  ;;  %v1730_v29 = vmul.f32 %v4454_v61, %v4373_v23  ;;  %v1607_v2 = vsel %vm4450_vm10, %v1606_v6, %v1602_v35  ;;  %v4512_v6 = vpop.f32.mrf.mxu0 }
 0x100   :  { %5429 = vst [vmem:[#allocation23_spill] sm:$0xff] %v4487_v55  ;;  %v3677_v17 = vpop.eup %3676  ;;  %vm1615_vm14 = vweird.f32 %v4361_v12  ;;  %vm4499_vm15 = vcmp.eq.f32.partialorder %v1618_v57, 8.507059e+37  ;;  %v4503_v14 = vor.u32 1.1754944e-38, %v1695_v37  ;;  %vm1704_vm0 = vweird.f32 %v4313_v34  ;;  %v3549_v57 = vld [vmem:[#allocation8 + $0xa0] sm:$0xff] }
 0x101   :  { %v4506_v55 = vor.u32 1.1754944e-38, %v1710_v13  ;;  %v3679_v54 = vpop.eup %3678  ;;  %v1613_v46 = vadd.f32 %v4361_v12, %v1612_v44  ;;  %v1687_v11 = vmul.f32 %v4402_v53, %v1686_v42  ;;  %vm1690_vm1 = vweird.f32 %v4402_v53  ;;  %v3557_v37 = vld [vmem:[#allocation8 + $0xe0] sm:$0xff]  ;;  %2437 = vmatpush.bf16.msra.mxu2 %v3549_v57  ;;  %vm4547_vm6 = vmor %vm1614_vm12, %vm1615_vm14 }
 0x102   :  { %v3126_v41 = vmul.f32 -1.442695, %v4474_v38  ;;  %v1702_v35 = vmul.f32 %v4410_v51, %v1701_v30  ;;  %v1716_v24 = vsub.f32 1.0, %v1715_v31  ;;  %3680 = vrcp.f32 %v4482_v8  ;;  %2456 = vmatpush.bf16.msra.mxu3 %v3557_v37  ;;  %v3539_v30 = vld [vmem:[#allocation8 + $0x50] sm:$0xff]  ;;  %2401 = vmatpush.bf16.msra.mxu0 %v3531_v16  ;;  %vm4569_vm7 = vmor %vm1689_vm13, %vm1690_vm1 }
 0x103   :  { %v4516_v13 = vadd.f32 1.0, %v3675_v19  ;;  %v1731_v44 = vsub.f32 1.0, %v1730_v29  ;;  %v1385_v42 = vmul.f32 %v4476_v52, %v4392_v5  ;;  %v4520_v43 = vadd.f32 1.0, %v3677_v17  ;;  %v4541_v29 = vpop.f32.mrf.mxu1  ;;  %v3556_v17 = vld [vmem:[#allocation8 + $0xd8] sm:$0xff]  ;;  %2420 = vmatpush.bf16.msra.mxu1 %v3539_v30 }
 0x104   :  { %v4524_v38 = vadd.f32 %v4394_v40, %v4319_v48  ;;  %v4527_v31 = vmul.f32 %v1607_v2, %v4048_v15  ;;  %vm4529_vm2 = vcmp.eq.f32.partialorder %v1693_v62, 8.507059e+37  ;;  %vm1705_vm3 = vweird.f32 %v4410_v51  ;;  %v3530_v15 = vld [vmem:[#allocation8 + $0x8] sm:$0xff] }
 0x105   :  { %vm4534_vm4 = vcmp.eq.f32.partialorder %v1708_v3, 8.507059e+37  ;;  %vm1719_vm5 = vweird.f32 %v4352_v56  ;;  %v4539_v40 = vadd.f32 1.0, %v3679_v54  ;;  %v1688_v2 = vadd.f32 %v4402_v53, %v1687_v11  ;;  %v3548_v54 = vld [vmem:[#allocation8 + $0x98] sm:$0xff]  ;;  %vm4589_vm9 = vmor %vm1704_vm0, %vm1705_vm3  ;;  %v4598_v1 = vpop.f32.mrf.mxu3 }
 0x106   :  { %5432 = vst [vmem:[#allocation24_spill] sm:$0xff] %v4524_v38  ;;  %v1723_v62 = vand.u32 2147483647, %v4352_v56  ;;  %v1725_v3 = vand.u32 2147483648, %v4352_v56  ;;  %3682 = vpow2.f32 %v3126_v41  ;;  %v1617_v57 = vsel %vm4547_vm6, %v4361_v12, %v1613_v46  ;;  %2438 = vmatpush.bf16.msra.mxu2 %v3548_v54  ;;  %2457 = vmatpush.bf16.msra.mxu3 %v3556_v17 }
 0x107   :  { %5433 = vst [vmem:[#allocation25_spill] sm:$0xff] %v4527_v31  ;;  %v1703_v20 = vadd.f32 %v4410_v51, %v1702_v35  ;;  %v1717_v37 = vmul.f32 %v4439_v60, %v1716_v24  ;;  %3684 = vrcp.f32 %v4516_v13  ;;  %v1732_v11 = vmul.f32 %v4454_v61, %v1731_v44  ;;  %v4577_v35 = vpop.f32.mrf.mxu2  ;;  %2402 = vmatpush.bf16.msra.mxu0 %v3530_v15  ;;  %v3576_v24 = vld [vmem:[#allocation8 + $0x178] sm:$0xff] }
 0x108   :  { %v1386_v31 = vsub.f32 1.0, %v1385_v42  ;;  %3686 = vrcp.f32 %v4520_v43  ;;  %v3127_v41 = vmul.f32 -1.442695, %v4524_v38  ;;  %v4563_v16 = vpop.eup %3680  ;;  %vm1734_vm8 = vweird.f32 %v4373_v23 }
 0x109   :  { %v1738_v12 = vand.u32 2147483647, %v4373_v23  ;;  %v1740_v46 = vand.u32 2147483648, %v4373_v23  ;;  %3688 = vrcp.f32 %v4539_v40  ;;  %v1622_v44 = vsel %vm4499_vm15, %v4478_v50, %v1617_v57 }
 0x10a   :  { %v1692_v39 = vsel %vm4569_vm7, %v4402_v53, %v1688_v2  ;;  %vm1720_vm10 = vweird.f32 %v4439_v60  ;;  %vm4594_vm11 = vcmp.eq.f32.partialorder %v1723_v62, 8.507059e+37  ;;  %v1707_v53 = vsel %vm4589_vm9, %v4410_v51, %v1703_v20  ;;  %v3538_v2 = vld [vmem:[#allocation8 + $0x48] sm:$0xff]  ;;  %v4613_v51 = vpop.f32.mrf.mxu0 }
 0x10b   :  { %v1718_v50 = vadd.f32 %v4439_v60, %v1717_v37  ;;  %vm1735_vm12 = vweird.f32 %v4454_v61  ;;  %v4607_v34 = vadd.f32 %v4400_v49, %v4328_v58  ;;  %v1733_v54 = vadd.f32 %v4454_v61, %v1732_v11  ;;  %2421 = vmatpush.bf16.msra.mxu1 %v3538_v2  ;;  %v3555_v11 = vld [vmem:[#allocation8 + $0xd0] sm:$0xff]  ;;  %vm4636_vm14 = vmor %vm1719_vm5, %vm1720_vm10  ;;  %v4661_v9 = vpop.f32.mrf.mxu1 }
 0x10c   :  { %v3683_v62 = vpop.eup %3682  ;;  %v1387_v17 = vmul.f32 %v4476_v52, %v1386_v31  ;;  %v1400_v57 = vmul.f32 %v4563_v16, %v4482_v8  ;;  %3690 = vpow2.f32 %v3127_v41  ;;  %v4618_v37 = vmul.f32 %v1622_v44, %v4115_v10  ;;  %v3547_v31 = vld [vmem:[#allocation8 + $0x90] sm:$0xff]  ;;  %vm4651_vm0 = vmor %vm1734_vm8, %vm1735_vm12  ;;  %2458 = vmatpush.bf16.msra.mxu3 %v3555_v11  ;;  %v3537_v44 = vld [vmem:[#allocation8 + $0x40] sm:$0xff] }
 0x10d   :  { %5446 = vst [vmem:[#allocation26_spill] sm:$0xff] %v4607_v34  ;;  %v4615_v20 = vpop.eup %3684  ;;  %v1726_v49 = vor.u32 1.1754944e-38, %v1725_v3  ;;  %vm4620_vm13 = vcmp.eq.f32.partialorder %v1738_v12, 8.507059e+37  ;;  %v1741_v42 = vor.u32 1.1754944e-38, %v1740_v46  ;;  %v1697_v41 = vsel %vm4529_vm2, %v4503_v14, %v1692_v39  ;;  %2439 = vmatpush.bf16.msra.mxu2 %v3547_v31  ;;  %v3546_v11 = vld [vmem:[#allocation8 + $0x88] sm:$0xff] }
 0x10e   :  { %5447 = vst [vmem:[#allocation27_spill] sm:$0xff] %v4618_v37  ;;  %v4624_v38 = vpop.eup %3686  ;;  %v1712_v10 = vsel %vm4534_vm4, %v4506_v55, %v1707_v53  ;;  %vm1389_vm15 = vweird.f32 %v4392_v5  ;;  %v1393_v12 = vand.u32 2147483647, %v4392_v5  ;;  %v1722_v14 = vsel %vm4636_vm14, %v4439_v60, %v1718_v50  ;;  %v3529_v60 = vld [vmem:[#allocation8] sm:$0xff] }
 0x10f   :  { %v4642_v46 = vpop.eup %3688  ;;  %vm1390_vm1 = vweird.f32 %v4476_v52  ;;  %v3128_v55 = vmul.f32 -1.442695, %v4607_v34  ;;  %v4659_v19 = vadd.f32 %v4426_v21, %v4185_v4  ;;  %v1737_v23 = vsel %vm4651_vm0, %v4454_v61, %v1733_v54  ;;  %2403 = vmatpush.bf16.msra.mxu0 %v3529_v60  ;;  %2422 = vmatpush.bf16.msra.mxu1 %v3537_v44  ;;  %v3554_v61 = vld [vmem:[#allocation8 + $0xc8] sm:$0xff] }
 0x110   :  { %v1388_v39 = vadd.f32 %v4476_v52, %v1387_v17  ;;  %v1401_v53 = vsub.f32 1.0, %v1400_v57  ;;  %v4667_v50 = vadd.f32 1.0, %v3683_v62  ;;  %v4670_v15 = vmul.f32 %v1697_v41, %v4133_v33  ;;  %vm4694_vm2 = vmor %vm1389_vm15, %vm1390_vm1  ;;  %2459 = vmatpush.bf16.msra.mxu3 %v3554_v61 }
 0x111   :  { %5454 = vst [vmem:[#allocation28_spill] sm:$0xff] %v4659_v19  ;;  %v1395_v21 = vand.u32 2147483648, %v4392_v5  ;;  %v1415_v2 = vmul.f32 %v4615_v20, %v4516_v13  ;;  %v1430_v31 = vmul.f32 %v4624_v38, %v4520_v43  ;;  %v4678_v17 = vmul.f32 %v1712_v10, %v4161_v18  ;;  %v4700_v10 = vpop.f32.mrf.mxu2  ;;  %2440 = vmatpush.bf16.msra.mxu2 %v3546_v11  ;;  %v3553_v11 = vld [vmem:[#allocation8 + $0xc0] sm:$0xff] }
 0x112   :  { %v3691_v54 = vpop.eup %3690  ;;  %v1727_v33 = vsel %vm4594_vm11, %v1726_v49, %v1722_v14  ;;  %v1505_v62 = vmul.f32 %v4642_v46, %v4539_v40  ;;  %v4686_v57 = vadd.f32 %v4445_v7, %v4280_v0  ;;  %v1742_v41 = vsel %vm4620_vm13, %v1741_v42, %v1737_v23  ;;  %v3568_v7 = vld [vmem:[#allocation8 + $0x138] sm:$0xff]  ;;  %v4708_v14 = vpop.f32.mrf.mxu3  ;;  %v3545_v23 = vld [vmem:[#allocation8 + $0x80] sm:$0xff] }
 0x113   :  { %v1408_v30 = vand.u32 2147483647, %v4482_v8  ;;  %3692 = vpow2.f32 %v3128_v55  ;;  %v3133_v49 = vmul.f32 -1.442695, %v4659_v19  ;;  %v1392_v42 = vsel %vm4694_vm2, %v4476_v52, %v1388_v39  ;;  %2472 = vmatpush.bf16.msrb.mxu0 %v3568_v7  ;;  %2491 = vmatpush.bf16.msrb.mxu1 %v3576_v24  ;;  %v3592_v7 = vld [vmem:[#allocation8 + $0x1f8] sm:$0xff]  ;;  %v3590_v19 = vld [vmem:[#allocation8 + $0x1e8] sm:$0xff] }
 0x114   :  { %5455 = vst [vmem:[#allocation29_spill] sm:$0xff] %v4686_v57  ;;  %v1402_v5 = vmul.f32 %v4563_v16, %v1401_v53  ;;  %v1410_v3 = vand.u32 2147483648, %v4482_v8  ;;  %3694 = vrcp.f32 %v4667_v50  ;;  %v1396_v56 = vor.u32 1.1754944e-38, %v1395_v21  ;;  %v4718_v53 = vpop.f32.mrf.mxu0  ;;  %2460 = vmatpush.bf16.msra.mxu3 %v3553_v11 }
 0x115   :  { %v1416_v55 = vsub.f32 1.0, %v1415_v2  ;;  %v1431_v60 = vsub.f32 1.0, %v1430_v31  ;;  %v4710_v44 = vadd.f32 1.0, %v3691_v54  ;;  %v4713_v61 = vmul.f32 %v1727_v33, %v4182_v47  ;;  %2441 = vmatpush.bf16.msra.mxu2 %v3545_v23  ;;  %v3567_v2 = vld [vmem:[#allocation8 + $0x130] sm:$0xff]  ;;  %v3574_v23 = vld [vmem:[#allocation8 + $0x168] sm:$0xff] }
 0x116   :  { %v4716_v52 = vmul.f32 %v1742_v41, %v4221_v26  ;;  %vm1394_vm3 = vcmp.eq.f32.partialorder %v1393_v12, 8.507059e+37  ;;  %v1506_v39 = vsub.f32 1.0, %v1505_v62  ;;  %vm1404_vm4 = vweird.f32 %v4482_v8  ;;  %v3575_v31 = vld [vmem:[#allocation8 + $0x170] sm:$0xff]  ;;  %v4732_v41 = vpop.f32.mrf.mxu1 }
 0x117   :  { %v1397_v18 = vsel %vm1394_vm3, %v1396_v56, %v1392_v42  ;;  %3696 = vpow2.f32 %v3133_v49  ;;  %v3134_v21 = vmul.f32 -1.442695, %v4686_v57  ;;  %v1403_v47 = vadd.f32 %v4563_v16, %v1402_v5  ;;  %2473 = vmatpush.bf16.msrb.mxu0 %v3567_v2  ;;  %2492 = vmatpush.bf16.msrb.mxu1 %v3575_v31  ;;  %v3584_v49 = vld [vmem:[#allocation8 + $0x1b8] sm:$0xff] }
 0x118   :  { %5458 = vst [vmem:[#allocation30_spill] sm:$0xff] %v4716_v52  ;;  %vm1405_vm5 = vweird.f32 %v4563_v16  ;;  %vm4724_vm6 = vcmp.eq.f32.partialorder %v1408_v30, 8.507059e+37  ;;  %v1411_v12 = vor.u32 1.1754944e-38, %v1410_v3  ;;  %v1417_v33 = vmul.f32 %v4615_v20, %v1416_v55  ;;  %2529 = vmatpush.bf16.msrb.mxu3 %v3592_v7  ;;  %v3565_v7 = vld [vmem:[#allocation8 + $0x120] sm:$0xff] }
 0x119   :  { %v3693_v54 = vpop.eup %3692  ;;  %vm1419_vm7 = vweird.f32 %v4516_v13  ;;  %v1432_v62 = vmul.f32 %v4624_v38, %v1431_v60  ;;  %3698 = vrcp.f32 %v4710_v44  ;;  %v4737_v24 = vmul.f32 %v1397_v18, %v4233_v22  ;;  %vm4746_vm8 = vmor %vm1404_vm4, %vm1405_vm5  ;;  %2510 = vmatpush.bf16.msrb.mxu2 %v3584_v49  ;;  %v3566_v60 = vld [vmem:[#allocation8 + $0x128] sm:$0xff]  ;;  %v4765_v49 = vpop.f32.mrf.mxu2 }
 0x11a   :  { %v4734_v30 = vpop.eup %3694  ;;  %v1423_v42 = vand.u32 2147483647, %v4516_v13  ;;  %v1425_v5 = vand.u32 2147483648, %v4516_v13  ;;  %v1507_v3 = vmul.f32 %v4642_v46, %v1506_v39  ;;  %vm1434_vm9 = vweird.f32 %v4520_v43 }
 0x11b   :  { %5461 = vst [vmem:[#allocation31_spill] sm:$0xff] %v4737_v24  ;;  %v1438_v55 = vand.u32 2147483647, %v4520_v43  ;;  %v1440_v22 = vand.u32 2147483648, %v4520_v43  ;;  %3700 = vpow2.f32 %v3134_v21  ;;  %v1407_v11 = vsel %vm4746_vm8, %v4563_v16, %v1403_v47  ;;  %2474 = vmatpush.bf16.msrb.mxu0 %v3566_v60  ;;  %2493 = vmatpush.bf16.msrb.mxu1 %v3574_v23  ;;  %v3583_v16 = vld [vmem:[#allocation8 + $0x1b0] sm:$0xff]  ;;  %v3573_v24 = vld [vmem:[#allocation8 + $0x160] sm:$0xff] }
 0x11c   :  { %vm1420_vm10 = vweird.f32 %v4615_v20  ;;  %v1513_v8 = vand.u32 2147483647, %v4539_v40  ;;  %v4758_v39 = vadd.f32 1.0, %v3693_v54  ;;  %v1418_v2 = vadd.f32 %v4615_v20, %v1417_v33  ;;  %v3591_v47 = vld [vmem:[#allocation8 + $0x1f0] sm:$0xff]  ;;  %v3582_v23 = vld [vmem:[#allocation8 + $0x1a8] sm:$0xff] }
 0x11d   :  { %v3697_v18 = vpop.eup %3696  ;;  %v1433_v31 = vadd.f32 %v4624_v38, %v1432_v62  ;;  %vm1435_vm11 = vweird.f32 %v4624_v38  ;;  %v1520_v21 = vmul.f32 %v4734_v30, %v4667_v50  ;;  %vm4767_vm12 = vcmp.eq.f32.partialorder %v1423_v42, 8.507059e+37  ;;  %v4773_v62 = vpop.f32.mrf.mxu3  ;;  %vm4781_vm14 = vmor %vm1419_vm7, %vm1420_vm10  ;;  %2511 = vmatpush.bf16.msrb.mxu2 %v3583_v16  ;;  %2530 = vmatpush.bf16.msrb.mxu3 %v3591_v47  ;;  %v3563_v54 = vld [vmem:[#allocation8 + $0x110] sm:$0xff] }
 0x11e   :  { %v1426_v56 = vor.u32 1.1754944e-38, %v1425_v5  ;;  %v1508_v33 = vadd.f32 %v4642_v46, %v1507_v3  ;;  %vm1510_vm13 = vweird.f32 %v4642_v46  ;;  %vm4785_vm15 = vcmp.eq.f32.partialorder %v1438_v55, 8.507059e+37  ;;  %vm4798_vm1 = vmor %vm1434_vm9, %vm1435_vm11  ;;  %v4808_v47 = vpop.f32.mrf.mxu0  ;;  %v3581_v55 = vld [vmem:[#allocation8 + $0x1a0] sm:$0xff] }
 0x11f   :  { %v4775_v57 = vpop.eup %3698  ;;  %vm1509_vm0 = vweird.f32 %v4539_v40  ;;  %v1515_v5 = vand.u32 2147483648, %v4539_v40  ;;  %v1530_v3 = vand.u32 2147483648, %v4667_v50  ;;  %v1412_v13 = vsel %vm4724_vm6, %v1411_v12, %v1407_v11  ;;  %2475 = vmatpush.bf16.msrb.mxu0 %v3565_v7  ;;  %2494 = vmatpush.bf16.msrb.mxu1 %v3573_v24  ;;  %v3572_v7 = vld [vmem:[#allocation8 + $0x158] sm:$0xff] }
 0x120   :  { %v1441_v34 = vor.u32 1.1754944e-38, %v1440_v22  ;;  %vm4802_vm2 = vcmp.eq.f32.partialorder %v1513_v8, 8.507059e+37  ;;  %v4806_v16 = vadd.f32 1.0, %v3697_v18  ;;  %v1422_v26 = vsel %vm4781_vm14, %v4615_v20, %v1418_v2  ;;  %vm4820_vm3 = vmor %vm1509_vm0, %vm1510_vm13  ;;  %v4832_v8 = vld [vmem:[#allocation7 + $0x8] sm:$0xff] }
 0x121   :  { %v3701_v52 = vpop.eup %3700  ;;  %v1437_v43 = vsel %vm4798_vm1, %v4624_v38, %v1433_v31  ;;  %v1521_v22 = vsub.f32 1.0, %v1520_v21  ;;  %3702 = vrcp.f32 %v4758_v39  ;;  %v1512_v20 = vsel %vm4820_vm3, %v4642_v46, %v1508_v33  ;;  %v4841_v21 = vpop.f32.mrf.mxu1  ;;  %2512 = vmatpush.bf16.msrb.mxu2 %v3582_v23  ;;  %2531 = vmatpush.bf16.msrb.mxu3 %v3590_v19  ;;  %v3564_v46 = vld [vmem:[#allocation8 + $0x118] sm:$0xff] }
 0x122   :  { %v1528_v11 = vand.u32 2147483647, %v4667_v50  ;;  %v1535_v38 = vmul.f32 %v4775_v57, %v4710_v44  ;;  %v1545_v40 = vand.u32 2147483648, %v4710_v44  ;;  %v1516_v18 = vor.u32 1.1754944e-38, %v1515_v5  ;;  %v4879_v12 = vpop.f32.mrf.mxu2  ;;  %v5481_v31 = vld [vmem:[#allocation18_spill] sm:$0xff] }
 0x123   :  { %v4834_v2 = vor.u32 1.1754944e-38, %v1530_v3  ;;  %v4839_v24 = vadd.f32 %v4512_v6, %v4185_v4  ;;  %v4844_v33 = vmul.f32 %v1412_v13, %v4316_v63  ;;  %v1427_v60 = vsel %vm4767_vm12, %v1426_v56, %v1422_v26  ;;  %v3589_v4 = vld [vmem:[#allocation8 + $0x1e0] sm:$0xff]  ;;  %2476 = vmatpush.bf16.msrb.mxu0 %v3564_v46  ;;  %2495 = vmatpush.bf16.msrb.mxu1 %v3572_v7 }
 0x124   :  { %v1442_v5 = vsel %vm4785_vm15, %v1441_v34, %v1437_v43  ;;  %v4850_v3 = vadd.f32 1.0, %v3701_v52  ;;  %v1517_v6 = vsel %vm4802_vm2, %v1516_v18, %v1512_v20  ;;  %v1522_v19 = vmul.f32 %v4734_v30, %v1521_v22  ;;  %v3571_v34 = vld [vmem:[#allocation8 + $0x150] sm:$0xff]  ;;  %v5483_v18 = vld [vmem:[#allocation19_spill] sm:$0xff] }
 0x125   :  { %vm1524_vm4 = vweird.f32 %v4667_v50  ;;  %3704 = vrcp.f32 %v4806_v16  ;;  %v4858_v63 = vperm.slane %v4832_v8, 0  ;;  %vm1525_vm5 = vweird.f32 %v4734_v30  ;;  %2513 = vmatpush.bf16.msrb.mxu2 %v3581_v55  ;;  %2532 = vmatpush.bf16.msrb.mxu3 %v3589_v4  ;;  %v3570_v55 = vld [vmem:[#allocation8 + $0x148] sm:$0xff] }
 0x126   :  { %v1536_v52 = vsub.f32 1.0, %v1535_v38  ;;  %v4861_v56 = vor.u32 1.1754944e-38, %v1545_v40  ;;  %v4865_v37 = vadd.f32 %v4541_v29, %v4280_v0  ;;  %v4870_v23 = vmul.f32 %v1427_v60, %v4359_v32  ;;  %v3588_v38 = vld [vmem:[#allocation8 + $0x1d8] sm:$0xff]  ;;  %v3562_v40 = vld [vmem:[#allocation8 + $0x108] sm:$0xff]  ;;  %vm4950_vm8 = vmor %vm1524_vm4, %vm1525_vm5 }
 0x127   :  { %v4867_v42 = vpop.eup %3702  ;;  %v4874_v13 = vadd.f32 %v4484_v59, %v4319_v48  ;;  %v3141_v26 = vmul.f32 -1.442695, %v4839_v24  ;;  %v1056_v43 = vadd.f32 %v4718_v53, %v4858_v63  ;;  %v4882_v0 = vmul.f32 %v1442_v5, %v4376_v27  ;;  %v4891_v59 = vpop.f32.mrf.mxu3  ;;  %2477 = vmatpush.bf16.msrb.mxu0 %v3563_v54  ;;  %2496 = vmatpush.bf16.msrb.mxu1 %v3571_v34  ;;  %v3579_v54 = vld [vmem:[#allocation8 + $0x190] sm:$0xff] }
 0x128   :  { %v4885_v29 = vmul.f32 %v1517_v6, %v4387_v28  ;;  %3706 = vrcp.f32 %v4850_v3  ;;  %v4889_v32 = vperm.slane %v4832_v8, 1  ;;  %v4894_v22 = vadd.f32 %v4734_v30, %v1522_v19  ;;  %v3580_v28 = vld [vmem:[#allocation8 + $0x198] sm:$0xff]  ;;  %v4914_v5 = vpop.f32.mrf.mxu0 }
 0x129   :  { %v1560_v20 = vand.u32 2147483648, %v4758_v39  ;;  %v1054_v27 = vadd.f32 %v4613_v51, %v4858_v63  ;;  %vm4900_vm6 = vcmp.eq.f32.partialorder %v1528_v11, 8.507059e+37  ;;  %v4905_v46 = vmul.f32 %v4775_v57, %v1536_v52  ;;  %2514 = vmatpush.bf16.msrb.mxu2 %v3580_v28  ;;  %2533 = vmatpush.bf16.msrb.mxu3 %v3588_v38  ;;  %v3561_v38 = vld [vmem:[#allocation8 + $0x100] sm:$0xff] }
 0x12a   :  { %v1550_v7 = vmul.f32 %v4867_v42, %v4758_v39  ;;  %v3142_v60 = vmul.f32 -1.442695, %v4865_v37  ;;  %v4912_v51 = vadd.f32 %v4577_v35, %v4319_v48  ;;  %v3135_v11 = vmul.f32 -1.442695, %v4874_v13 }
 0x12b   :  { %v4916_v4 = vpop.eup %3704  ;;  %3708 = vpow2.f32 %v3141_v26  ;;  %v4921_v6 = vadd.f32 %v4598_v1, %v4328_v58  ;;  %v1844_v19 = vmul.f32 %v4283_v25, %v1056_v43  ;;  %v4926_v48 = vadd.f32 %v4494_v45, %v4328_v58  ;;  %v3587_v1 = vld [vmem:[#allocation8 + $0x1d0] sm:$0xff]  ;;  %v4942_v45 = vpop.f32.mrf.mxu1  ;;  %2478 = vmatpush.bf16.msrb.mxu0 %v3562_v40  ;;  %2497 = vmatpush.bf16.msrb.mxu1 %v3570_v55  ;;  %v5480_v25 = vld [vmem:[#allocation15_spill] sm:$0xff] }
 0x12c   :  { %v1073_v35 = vadd.f32 %v4661_v9, %v4889_v32  ;;  %v4931_v34 = vperm.slane %v4832_v8, 2  ;;  %v1075_v52 = vadd.f32 %v4732_v41, %v4889_v32  ;;  %vm1540_vm7 = vweird.f32 %v4775_v57 }
 0x12d   :  { %v1836_v43 = vmul.f32 %v4136_v36, %v1054_v27  ;;  %v4940_v58 = vperm.slane %v4832_v8, 3  ;;  %v1551_v28 = vsub.f32 1.0, %v1550_v7  ;;  %v1625_v36 = vmul.f32 %v4916_v4, %v4806_v16  ;;  %2515 = vmatpush.bf16.msrb.mxu2 %v3579_v54  ;;  %v3569_v7 = vld [vmem:[#allocation8 + $0x140] sm:$0xff]  ;;  %2534 = vmatpush.bf16.msrb.mxu3 %v3587_v1 }
 0x12e   :  { %v4944_v9 = vpop.eup %3706  ;;  %3710 = vpow2.f32 %v3142_v60  ;;  %v3143_v27 = vmul.f32 -1.442695, %v4912_v51  ;;  %v1527_v40 = vsel %vm4950_vm8, %v4734_v30, %v4894_v22  ;;  %vm1539_vm9 = vweird.f32 %v4710_v44  ;;  %v3578_v30 = vld [vmem:[#allocation8 + $0x188] sm:$0xff] }
 0x12f   :  { %3712 = vpow2.f32 %v3135_v11  ;;  %v3144_v50 = vmul.f32 -1.442695, %v4921_v6  ;;  %v1868_v55 = vpack.c.bf16 %v1844_v19, %v1836_v43  ;;  %vm1554_vm10 = vweird.f32 %v4758_v39  ;;  %v4980_v43 = vpop.f32.mrf.mxu3  ;;  %2479 = vmatpush.bf16.msrb.mxu0 %v3561_v38  ;;  %2498 = vmatpush.bf16.msrb.mxu1 %v3569_v7  ;;  %vm5032_vm15 = vmor %vm1539_vm9, %vm1540_vm7 }
 0x130   :  { %v3136_v60 = vmul.f32 -1.442695, %v4926_v48  ;;  %v1837_v26 = vmul.f32 %v5480_v25, %v1073_v35  ;;  %v1092_v53 = vadd.f32 %v4700_v10, %v4931_v34  ;;  %v1845_v41 = vmul.f32 %v5481_v31, %v1075_v52  ;;  %v4977_v25 = vpop.f32.mrf.mxu2  ;;  %v3586_v10 = vld [vmem:[#allocation8 + $0x1c8] sm:$0xff]  ;;  %v4998_v38 = vpop.f32.mrf.mxu0 }
 0x131   :  { %v3709_v22 = vpop.eup %3708  ;;  %v1640_v11 = vmul.f32 %v4944_v9, %v4850_v3  ;;  %v1111_v19 = vadd.f32 %v4708_v14, %v4940_v58  ;;  %v1094_v54 = vadd.f32 %v4765_v49, %v4931_v34  ;;  %v1113_v35 = vadd.f32 %v4773_v62, %v4940_v58  ;;  %2404 = vmatmul.bf16.vlgmr.msra.gmra.mxu0 %v1868_v55  ;;  %v5485_v55 = vld [vmem:[#allocation20_spill] sm:$0xff] }
 0x132   :  { %v1552_v31 = vmul.f32 %v4867_v42, %v1551_v28  ;;  %v1626_v52 = vsub.f32 1.0, %v1625_v36  ;;  %3714 = vpow2.f32 %v3143_v27  ;;  %v1869_v1 = vpack.c.bf16 %v1845_v41, %v1837_v26  ;;  %v5482_v36 = vld [vmem:[#allocation16_spill] sm:$0xff]  ;;  %2516 = vmatpush.bf16.msrb.mxu2 %v3578_v30  ;;  %2535 = vmatpush.bf16.msrb.mxu3 %v3586_v10  ;;  %v3577_v10 = vld [vmem:[#allocation8 + $0x180] sm:$0xff] }
 0x133   :  { %v1532_v14 = vsel %vm4900_vm6, %v4834_v2, %v1527_v40  ;;  %v4987_v49 = vadd.f32 %v4775_v57, %v4905_v46  ;;  %v4991_v62 = vor.u32 1.1754944e-38, %v1560_v20  ;;  %3716 = vpow2.f32 %v3144_v50  ;;  %v5484_v40 = vld [vmem:[#allocation17_spill] sm:$0xff] }
 0x134   :  { %v3711_v28 = vpop.eup %3710  ;;  %vm1629_vm11 = vweird.f32 %v4806_v16  ;;  %3718 = vpow2.f32 %v3136_v60  ;;  %v4994_v26 = vadd.f32 1.0, %v3709_v22  ;;  %v1838_v27 = vmul.f32 %v5482_v36, %v1092_v53  ;;  %2423 = vmatmul.bf16.vlgmr.msra.gmra.mxu1 %v1869_v1  ;;  %v5486_v60 = vld [vmem:[#allocation22_spill] sm:$0xff]  ;;  %v3585_v1 = vld [vmem:[#allocation8 + $0x1c0] sm:$0xff] }
 0x135   :  { %v1846_v2 = vmul.f32 %v5483_v18, %v1094_v54  ;;  %v3713_v46 = vpop.eup %3712  ;;  %vm1555_vm12 = vweird.f32 %v4867_v42  ;;  %v1641_v20 = vsub.f32 1.0, %v1640_v11  ;;  %v1839_v50 = vmul.f32 %v5484_v40, %v1111_v19  ;;  %v5026_v40 = vpop.f32.mrf.mxu1 }
 0x136   :  { %v1847_v7 = vmul.f32 %v5485_v55, %v1113_v35  ;;  %v5004_v41 = vmul.f32 %v1532_v14, %v5486_v60  ;;  %v5487_v53 = vand.u32 2147483647, %v4710_v44  ;;  %v1553_v30 = vadd.f32 %v4867_v42, %v1552_v31  ;;  %vm5053_vm0 = vmor %vm1554_vm10, %vm1555_vm12  ;;  %2517 = vmatpush.bf16.msrb.mxu2 %v3577_v10  ;;  %2536 = vmatpush.bf16.msrb.mxu3 %v3585_v1 }
 0x137   :  { %v5490_v54 = vand.u32 2147483647, %v4758_v39  ;;  %v1627_v19 = vmul.f32 %v4916_v4, %v1626_v52  ;;  %v1870_v35 = vpack.c.bf16 %v1846_v2, %v1838_v27  ;;  %v5020_v14 = vadd.f32 1.0, %v3711_v28 }
 0x138   :  { %vm5008_vm13 = vcmp.eq.f32.partialorder %v5487_v53, 8.507059e+37  ;;  %v1871_v36 = vpack.c.bf16 %v1847_v7, %v1839_v50  ;;  %v1059_v18 = vadd.f32 %v4808_v47, %v4858_v63  ;;  %v1061_v31 = vadd.f32 %v4914_v5, %v4858_v63  ;;  %v3715_v55 = vpop.eup %3714  ;;  %v5501_v7 = vld [vmem:[#allocation21_spill] sm:$0xff]  ;;  %v5078_v53 = vpop.f32.mrf.mxu2 }
 0x139   :  { %vm5015_vm14 = vcmp.eq.f32.partialorder %v5490_v54, 8.507059e+37  ;;  %v5495_v28 = vand.u32 2147483648, %v4806_v16  ;;  %v5040_v2 = vadd.f32 1.0, %v3713_v46  ;;  %3720 = vrcp.f32 %v4994_v26  ;;  %2442 = vmatmul.bf16.vlgmr.msra.gmra.mxu2 %v1870_v35  ;;  %v3717_v63 = vpop.eup %3716  ;;  %v1131_v52 = vpop.f32.mrf.mxu0 }
 0x13a   :  { %v1080_v47 = vadd.f32 %v4942_v45, %v4889_v32  ;;  %v1542_v44 = vsel %vm5032_vm15, %v4775_v57, %v4987_v49  ;;  %v1642_v46 = vmul.f32 %v4944_v9, %v1641_v20  ;;  %vm1644_vm1 = vweird.f32 %v4850_v3  ;;  %2461 = vmatmul.bf16.vlgmr.msra.gmra.mxu3 %v1871_v36  ;;  %v3719_v50 = vpop.eup %3718 }
 0x13b   :  { %v5038_v27 = vor.u32 1.1754944e-38, %v5495_v28  ;;  %v1860_v45 = vmul.f32 %v4670_v15, %v1061_v31  ;;  %v1557_v57 = vsel %vm5053_vm0, %v4867_v42, %v1553_v30  ;;  %vm1630_vm2 = vweird.f32 %v4916_v4 }
 0x13c   :  { %v5498_v39 = vand.u32 2147483647, %v4806_v16  ;;  %vm1645_vm4 = vweird.f32 %v4944_v9  ;;  %v1078_v20 = vadd.f32 %v4841_v21, %v4889_v32  ;;  %v1628_v15 = vadd.f32 %v4916_v4, %v1627_v19  ;;  %v5086_v32 = vpop.f32.mrf.mxu3  ;;  %vm5110_vm5 = vmor %vm1629_vm11, %vm1630_vm2 }
 0x13d   :  { %3722 = vrcp.f32 %v5020_v14  ;;  %v5075_v42 = vadd.f32 1.0, %v3715_v55  ;;  %v1852_v60 = vmul.f32 %v5501_v7, %v1059_v18  ;;  %v5081_v30 = vadd.f32 1.0, %v3717_v63  ;;  %vm5124_vm6 = vmor %vm1644_vm1, %vm1645_vm4  ;;  %v1150_v11 = vpop.f32.mrf.mxu1 }
 0x13e   :  { %vm5066_vm3 = vcmp.eq.f32.partialorder %v5498_v39, 8.507059e+37  ;;  %3724 = vrcp.f32 %v5040_v2  ;;  %v1861_v54 = vmul.f32 %v4678_v17, %v1080_v47  ;;  %v1099_v21 = vadd.f32 %v4977_v25, %v4931_v34  ;;  %v5502_v17 = vld [vmem:[#allocation23_spill] sm:$0xff] }
 0x13f   :  { %v1643_v19 = vadd.f32 %v4944_v9, %v1642_v46  ;;  %v5089_v35 = vadd.f32 1.0, %v3719_v50  ;;  %v1118_v10 = vadd.f32 %v4980_v43, %v4940_v58  ;;  %v1876_v1 = vpack.c.bf16 %v1860_v45, %v1852_v60  ;;  %v5093_v36 = vpop.eup %3720  ;;  %v5509_v45 = vld [vmem:[#allocation25_spill] sm:$0xff] }
 0x140   :  { %v1648_v18 = vand.u32 2147483647, %v4850_v3  ;;  %v1650_v31 = vand.u32 2147483648, %v4850_v3  ;;  %v1853_v55 = vmul.f32 %v5502_v17, %v1078_v20  ;;  %v1097_v25 = vadd.f32 %v4879_v12, %v4931_v34  ;;  %v5512_v17 = vld [vmem:[#allocation28_spill] sm:$0xff] }
 0x141   :  { %v1547_v28 = vsel %vm5008_vm13, %v4861_v56, %v1542_v44  ;;  %v1562_v43 = vsel %vm5015_vm14, %v4991_v62, %v1557_v57  ;;  %3726 = vrcp.f32 %v5075_v42  ;;  %v1116_v12 = vadd.f32 %v4891_v59, %v4940_v58  ;;  %2409 = vmatmul.bf16.gmra.mxu0 %v1876_v1  ;;  %v5508_v44 = vld [vmem:[#allocation24_spill] sm:$0xff]  ;;  %v5510_v57 = vld [vmem:[#allocation27_spill] sm:$0xff] }
 0x142   :  { %v1632_v56 = vsel %vm5110_vm5, %v4916_v4, %v1628_v15  ;;  %3728 = vrcp.f32 %v5081_v30  ;;  %v1862_v16 = vmul.f32 %v4713_v61, %v1099_v21  ;;  %v1877_v62 = vpack.c.bf16 %v1861_v54, %v1853_v55  ;;  %v5507_v4 = vld [vmem:[#allocation30_spill] sm:$0xff] }
 0x143   :  { %v5130_v22 = vpop.eup %3722  ;;  %v1647_v59 = vsel %vm5124_vm6, %v4944_v9, %v1643_v19  ;;  %3730 = vrcp.f32 %v5089_v35  ;;  %v1745_v3 = vmul.f32 %v5093_v36, %v4994_v26  ;;  %v1863_v58 = vmul.f32 %v5507_v4, %v1118_v10  ;;  %v5511_v15 = vld [vmem:[#allocation26_spill] sm:$0xff] }
 0x144   :  { %v5139_v63 = vpop.eup %3724  ;;  %v5142_v61 = vmul.f32 %v1547_v28, %v5508_v44  ;;  %v1651_v5 = vor.u32 1.1754944e-38, %v1650_v31  ;;  %v1665_v46 = vand.u32 2147483648, %v5040_v2  ;;  %v1854_v50 = vmul.f32 %v5509_v45, %v1097_v25  ;;  %2428 = vmatmul.bf16.gmra.mxu1 %v1877_v62  ;;  %v1188_v47 = vpop.f32.mrf.mxu3 }
 0x145   :  { %v1637_v9 = vsel %vm5066_vm3, %v5038_v27, %v1632_v56  ;;  %vm1649_vm7 = vcmp.eq.f32.partialorder %v1648_v18, 8.507059e+37  ;;  %v1855_v39 = vmul.f32 %v5510_v57, %v1116_v12  ;;  %v5151_v20 = vperm.slane %v4832_v8, 4  ;;  %v1169_v18 = vpop.f32.mrf.mxu2  ;;  %v5513_v56 = vld [vmem:[#allocation29_spill] sm:$0xff] }
 0x146   :  { %v5154_v7 = vmul.f32 %v1562_v43, %v5511_v15  ;;  %v1652_v60 = vsel %vm1649_vm7, %v1651_v5, %v1647_v59  ;;  %v1760_v54 = vmul.f32 %v5130_v22, %v5020_v14  ;;  %v1878_v21 = vpack.c.bf16 %v1862_v16, %v1854_v50 }
 0x147   :  { %v5158_v19 = vpop.eup %3726  ;;  %v1655_v27 = vmul.f32 %v5139_v63, %v5040_v2  ;;  %v1746_v49 = vsub.f32 1.0, %v1745_v3  ;;  %v1879_v10 = vpack.c.bf16 %v1863_v58, %v1855_v39  ;;  %v1132_v1 = vadd.f32 %v1131_v52, %v5151_v20  ;;  %v5187_v58 = vpop.f32.mrf.mxu0  ;;  %v5514_v39 = vld [vmem:[#allocation31_spill] sm:$0xff] }
 0x148   :  { %v5163_v31 = vpop.eup %3728  ;;  %v5166_v55 = vmul.f32 %v1637_v9, %v5512_v17  ;;  %v1663_v25 = vand.u32 2147483647, %v5040_v2  ;;  %v5169_v28 = vor.u32 1.1754944e-38, %v1665_v46  ;;  %v5172_v43 = vperm.slane %v4832_v8, 5 }
 0x149   :  { %v5174_v12 = vpop.eup %3730  ;;  %v5177_v34 = vmul.f32 %v1652_v60, %v5513_v56  ;;  %vm1749_vm8 = vweird.f32 %v4994_v26  ;;  %v1753_v52 = vand.u32 2147483647, %v4994_v26  ;;  %v1130_v16 = vadd.f32 %v4998_v38, %v5151_v20  ;;  %2447 = vmatmul.bf16.gmra.mxu2 %v1878_v21  ;;  %v5208_v60 = vpop.f32.mrf.mxu1 }
 0x14a   :  { %v1755_v62 = vand.u32 2147483648, %v4994_v26  ;;  %v1761_v59 = vsub.f32 1.0, %v1760_v54  ;;  %v1775_v3 = vmul.f32 %v5158_v19, %v5075_v42  ;;  %v1151_v4 = vadd.f32 %v1150_v11, %v5172_v43  ;;  %2466 = vmatmul.bf16.gmra.mxu3 %v1879_v10 }
 0x14b   :  { %v1656_v44 = vsub.f32 1.0, %v1655_v27  ;;  %v1747_v5 = vmul.f32 %v5093_v36, %v1746_v49  ;;  %v1790_v46 = vmul.f32 %v5163_v31, %v5081_v30  ;;  %v1848_v38 = vmul.f32 %v4885_v29, %v1132_v1 }
 0x14c   :  { %v1670_v45 = vmul.f32 %v5174_v12, %v5089_v35  ;;  %vm1764_vm9 = vweird.f32 %v5020_v14  ;;  %v1768_v50 = vand.u32 2147483647, %v5020_v14  ;;  %v1149_v11 = vadd.f32 %v5026_v40, %v5172_v43 }
 0x14d   :  { %v5200_v9 = vperm.slane %v4832_v8, 6  ;;  %vm1750_vm10 = vweird.f32 %v5093_v36  ;;  %v1770_v57 = vand.u32 2147483648, %v5020_v14  ;;  %v1840_v15 = vmul.f32 %v5514_v39, %v1130_v16 }
 0x14e   :  { %v5206_v29 = vperm.slane %v4832_v8, 7  ;;  %v1762_v54 = vmul.f32 %v5130_v22, %v1761_v59  ;;  %v1776_v21 = vsub.f32 1.0, %v1775_v3  ;;  %v1849_v27 = vmul.f32 %v5004_v41, %v1151_v4  ;;  %v5228_v3 = vpop.f32.mrf.mxu2  ;;  %vm5235_vm0 = vmor %vm1749_vm8, %vm1750_vm10 }
 0x14f   :  { %v1170_v40 = vadd.f32 %v1169_v18, %v5200_v9  ;;  %v1748_v49 = vadd.f32 %v5093_v36, %v1747_v5  ;;  %v1791_v10 = vsub.f32 1.0, %v1790_v46  ;;  %v1872_v1 = vpack.c.bf16 %v1848_v38, %v1840_v15 }
 0x150   :  { %v1189_v17 = vadd.f32 %v1188_v47, %v5206_v29  ;;  %vm1660_vm11 = vweird.f32 %v5139_v63  ;;  %v1671_v56 = vsub.f32 1.0, %v1670_v45  ;;  %vm5216_vm12 = vcmp.eq.f32.partialorder %v1753_v52, 8.507059e+37 }
 0x151   :  { %v1841_v16 = vmul.f32 %v4844_v33, %v1149_v11  ;;  %v1168_v41 = vadd.f32 %v5078_v53, %v5200_v9  ;;  %v1657_v18 = vmul.f32 %v5139_v63, %v1656_v44  ;;  %vm1675_vm13 = vweird.f32 %v5174_v12  ;;  %2480 = vmatmul.bf16.vlgmr.msrb.gmra.mxu0 %v1872_v1  ;;  %v1136_v11 = vpop.f32.mrf.mxu0 }
 0x152   :  { %v1756_v59 = vor.u32 1.1754944e-38, %v1755_v62  ;;  %vm1765_vm14 = vweird.f32 %v5130_v22  ;;  %v1187_v47 = vadd.f32 %v5086_v32, %v5206_v29  ;;  %vm1659_vm15 = vweird.f32 %v5040_v2  ;;  %v5242_v32 = vpop.f32.mrf.mxu3 }
 0x153   :  { %v1763_v53 = vadd.f32 %v5130_v22, %v1762_v54  ;;  %v1777_v52 = vmul.f32 %v5158_v19, %v1776_v21  ;;  %v1873_v62 = vpack.c.bf16 %v1849_v27, %v1841_v16  ;;  %v1850_v4 = vmul.f32 %v5142_v61, %v1170_v40  ;;  %vm5261_vm4 = vmor %vm1764_vm9, %vm1765_vm14  ;;  %v1155_v27 = vpop.f32.mrf.mxu1 }
 0x154   :  { %vm1674_vm1 = vweird.f32 %v5089_v35  ;;  %v1752_v44 = vsel %vm5235_vm0, %v5093_v36, %v1748_v49  ;;  %vm5248_vm2 = vcmp.eq.f32.partialorder %v1768_v50, 8.507059e+37  ;;  %v1792_v5 = vmul.f32 %v5163_v31, %v1791_v10 }
 0x155   :  { %v1851_v46 = vmul.f32 %v5154_v7, %v1189_v17  ;;  %v1672_v38 = vmul.f32 %v5174_v12, %v1671_v56  ;;  %v1771_v61 = vor.u32 1.1754944e-38, %v1770_v57  ;;  %vm1779_vm3 = vweird.f32 %v5075_v42  ;;  %2499 = vmatmul.bf16.vlgmr.msrb.gmra.mxu1 %v1873_v62 }
 0x156   :  { %v1842_v45 = vmul.f32 %v4870_v23, %v1168_v41  ;;  %vm1780_vm5 = vweird.f32 %v5158_v19  ;;  %v1783_v7 = vand.u32 2147483647, %v5075_v42  ;;  %v1785_v50 = vand.u32 2147483648, %v5075_v42 }
 0x157   :  { %v1843_v57 = vmul.f32 %v4882_v0, %v1187_v47  ;;  %vm5271_vm6 = vcmp.eq.f32.partialorder %v1663_v25, 8.507059e+37  ;;  %v1757_v14 = vsel %vm5216_vm12, %v1756_v59, %v1752_v44  ;;  %v1767_v39 = vsel %vm5261_vm4, %v5130_v22, %v1763_v53  ;;  %vm5295_vm9 = vmor %vm1779_vm3, %vm1780_vm5  ;;  %v1174_v59 = vpop.f32.mrf.mxu2 }
 0x158   :  { %v1778_v15 = vadd.f32 %v5158_v19, %v1777_v52  ;;  %v1874_v54 = vpack.c.bf16 %v1850_v4, %v1842_v45  ;;  %v1793_v21 = vadd.f32 %v5163_v31, %v1792_v5  ;;  %vm1795_vm7 = vweird.f32 %v5163_v31  ;;  %vm5318_vm12 = vmor %vm1659_vm15, %vm1660_vm11 }
 0x159   :  { %v1875_v0 = vpack.c.bf16 %v1851_v46, %v1843_v57  ;;  %v1137_v25 = vadd.f32 %v1136_v11, %v5151_v20  ;;  %v1658_v40 = vadd.f32 %v5139_v63, %v1657_v18  ;;  %v1673_v49 = vadd.f32 %v5174_v12, %v1672_v38  ;;  %vm5332_vm11 = vmor %vm1674_vm1, %vm1675_vm13 }
 0x15a   :  { %vm1794_vm8 = vweird.f32 %v5081_v30  ;;  %v1800_v22 = vand.u32 2147483648, %v5081_v30  ;;  %v1832_v10 = vmul.f32 %v1757_v14, %v4839_v24  ;;  %v1772_v1 = vsel %vm5248_vm2, %v1771_v61, %v1767_v39  ;;  %2518 = vmatmul.bf16.vlgmr.msrb.gmra.mxu2 %v1874_v54  ;;  %v1193_v52 = vpop.f32.mrf.mxu3 }
 0x15b   :  { %v1798_v56 = vand.u32 2147483647, %v5081_v30  ;;  %v1135_v8 = vadd.f32 %v5187_v58, %v5151_v20  ;;  %v1678_v16 = vand.u32 2147483647, %v5089_v35  ;;  %v1680_v24 = vand.u32 2147483648, %v5089_v35  ;;  %vm5309_vm10 = vmor %vm1794_vm8, %vm1795_vm7  ;;  %2537 = vmatmul.bf16.vlgmr.msrb.gmra.mxu3 %v1875_v0 }
 0x15c   :  { %v1782_v41 = vsel %vm5295_vm9, %v5158_v19, %v1778_v15  ;;  %v1156_v30 = vadd.f32 %v1155_v27, %v5172_v43  ;;  %vm1784_vm14 = vcmp.eq.f32.partialorder %v1783_v7, 8.507059e+37  ;;  %v1786_v58 = vor.u32 1.1754944e-38, %v1785_v50 }
 0x15d   :  { %v1797_v19 = vsel %vm5309_vm10, %v5163_v31, %v1793_v21  ;;  %v1864_v18 = vmul.f32 %v1832_v10, %v1137_v25  ;;  %v1662_v47 = vsel %vm5318_vm12, %v5139_v63, %v1658_v40  ;;  %v1833_v33 = vmul.f32 %v1772_v1, %v4865_v37 }
 0x15e   :  { %v1801_v53 = vor.u32 1.1754944e-38, %v1800_v22  ;;  %v1154_v31 = vadd.f32 %v5208_v60, %v5172_v43  ;;  %v1677_v62 = vsel %vm5332_vm11, %v5174_v12, %v1673_v49  ;;  %v1787_v63 = vsel %vm1784_vm14, %v1786_v58, %v1782_v41 }
 0x15f   :  { %vm1799_vm15 = vcmp.eq.f32.partialorder %v1798_v56, 8.507059e+37  ;;  %v1856_v4 = vmul.f32 %v5166_v55, %v1135_v8  ;;  %v1681_v35 = vor.u32 1.1754944e-38, %v1680_v24  ;;  %v1865_v26 = vmul.f32 %v1833_v33, %v1156_v30 }
 0x160   :  { %v1802_v44 = vsel %vm1799_vm15, %v1801_v53, %v1797_v19  ;;  %v1175_v5 = vadd.f32 %v1174_v59, %v5200_v9  ;;  %v1667_v37 = vsel %vm5271_vm6, %v5169_v28, %v1662_v47  ;;  %vm1679_vm13 = vcmp.eq.f32.partialorder %v1678_v16, 8.507059e+37  ;;  %v3603_v19 = vld [vmem:[%s5370_s4] ss:$0 sm:$0xff]  ;;  %s3869_s4 = smov [#allocation10]  }
 0x161   :  { %v1194_v43 = vadd.f32 %v1193_v52, %v5206_v29  ;;  %v1880_v60 = vpack.c.bf16 %v1864_v18, %v1856_v4  ;;  %v1682_v46 = vsel %vm1679_vm13, %v1681_v35, %v1677_v62  ;;  %v1834_v12 = vmul.f32 %v1787_v63, %v4912_v51  ;;  %s2584_s16 = sshll.u32 %s3869_s4, 4  ;;  %s2585_s16 = int_to_ptr.vmem [resolvable:$true] %s2584_s16 }
 0x162   :  { %v1857_v38 = vmul.f32 %v5177_v34, %v1154_v31  ;;  %v1173_v55 = vadd.f32 %v5228_v3, %v5200_v9  ;;  %v1835_v61 = vmul.f32 %v1802_v44, %v4921_v6  ;;  %v1192_v45 = vadd.f32 %v5242_v32, %v5206_v29 }
 0x163   :  { %v1826_v11 = vmul.f32 %v1667_v37, %v4874_v13  ;;  %v1866_v28 = vmul.f32 %v1834_v12, %v1175_v5  ;;  %v1827_v7 = vmul.f32 %v1682_v46, %v4926_v48  ;;  %2485 = vmatmul.bf16.gmra.mxu0 %v1880_v60 }
 0x164   :  { %v1881_v36 = vpack.c.bf16 %v1865_v26, %v1857_v38  ;;  %v1867_v50 = vmul.f32 %v1835_v61, %v1194_v43 }
 0x165   :  { %v1858_v57 = vmul.f32 %v1826_v11, %v1173_v55  ;;  %v1859_v51 = vmul.f32 %v1827_v7, %v1192_v45 }
 0x166   :  { %2504 = vmatmul.bf16.gmra.mxu1 %v1881_v36 }
 0x167   :  { %v1882_v34 = vpack.c.bf16 %v1866_v28, %v1858_v57  ;;  %v1883_v23 = vpack.c.bf16 %v1867_v50, %v1859_v51 }
 0x16a   :  { %2523 = vmatmul.bf16.gmra.mxu2 %v1882_v34 }
 0x16b   :  { %2542 = vmatmul.bf16.gmra.mxu3 %v1883_v23 }
 0x1ae   :  { %v2405_v9 = vpop.f32.mrf.mxu0 }
 0x1b1   :  { %v2424_v6 = vpop.f32.mrf.mxu1 }
 0x1b2   :  { %v2425_v27 = vadd.f32 %v2424_v6, %v2405_v9 }
 0x1b6   :  { %v2407_v3 = vpop.f32.mrf.mxu0 }
 0x1b9   :  { %v2426_v14 = vpop.f32.mrf.mxu1 }
 0x1ba   :  { %v2427_v56 = vadd.f32 %v2426_v14, %v2407_v3 }
 0x1bc   :  { %v2443_v29 = vpop.f32.mrf.mxu2 }
 0x1bd   :  { %v2462_v32 = vpop.f32.mrf.mxu3  ;;  %v2444_v49 = vadd.f32 %v2443_v29, %v2425_v27 }
 0x1be   :  { %v2410_v13 = vpop.f32.mrf.mxu0 }
 0x1bf   :  { %v2463_v1 = vadd.f32 %v2462_v32, %v2444_v49 }
 0x1c1   :  { %v2429_v39 = vpop.f32.mrf.mxu1 }
 0x1c2   :  { %v2430_v59 = vadd.f32 %v2429_v39, %v2410_v13 }
 0x1c4   :  { %v2445_v15 = vpop.f32.mrf.mxu2 }
 0x1c5   :  { %v2464_v54 = vpop.f32.mrf.mxu3  ;;  %v2446_v24 = vadd.f32 %v2445_v15, %v2427_v56 }
 0x1c6   :  { %v2412_v48 = vpop.f32.mrf.mxu0 }
 0x1c7   :  { %v2465_v30 = vadd.f32 %v2464_v54, %v2446_v24 }
 0x1c9   :  { %v2431_v21 = vpop.f32.mrf.mxu1 }
 0x1ca   :  { %v2432_v44 = vadd.f32 %v2431_v21, %v2412_v48 }
 0x1cc   :  { %v2448_v0 = vpop.f32.mrf.mxu2 }
 0x1cd   :  { %v2467_v25 = vpop.f32.mrf.mxu3  ;;  %v2449_v33 = vadd.f32 %v2448_v0, %v2430_v59 }
 0x1ce   :  { %v2481_v40 = vpop.f32.mrf.mxu0 }
 0x1cf   :  { %v2482_v8 = vadd.f32 %v2481_v40, %v2463_v1  ;;  %v2468_v63 = vadd.f32 %v2467_v25, %v2449_v33 }
 0x1d2   :  { %v2500_v22 = vpop.f32.mrf.mxu1 }
 0x1d3   :  { %v2501_v41 = vadd.f32 %v2500_v22, %v2482_v8 }
 0x1d4   :  { %v2450_v10 = vpop.f32.mrf.mxu2 }
 0x1d5   :  { %v2469_v17 = vpop.f32.mrf.mxu3  ;;  %v2451_v43 = vadd.f32 %v2450_v10, %v2432_v44 }
 0x1d6   :  { %v2483_v16 = vpop.f32.mrf.mxu0 }
 0x1d7   :  { %v2484_v47 = vadd.f32 %v2483_v16, %v2465_v30  ;;  %v2470_v55 = vadd.f32 %v2469_v17, %v2451_v43 }
 0x1da   :  { %v2502_v18 = vpop.f32.mrf.mxu1 }
 0x1db   :  { %v2503_v52 = vadd.f32 %v2502_v18, %v2484_v47 }
 0x1dd   :  { %v2519_v42 = vpop.f32.mrf.mxu2 }
 0x1de   :  { %v2520_v20 = vadd.f32 %v2519_v42, %v2501_v41  ;;  %v2538_v58 = vpop.f32.mrf.mxu3 }
 0x1e0   :  { %v2539_v2 = vadd.f32 %v2538_v58, %v2520_v20  ;;  %v2486_v31 = vpop.f32.mrf.mxu0 }
 0x1e1   :  { %v2487_v26 = vadd.f32 %v2486_v31, %v2468_v63 }
 0x1e2   :  { %v2556_v53 = vadd.f32 %v3603_v19, %v2539_v2 }
 0x1e3   :  { %v2505_v37 = vpop.f32.mrf.mxu1 }
 0x1e4   :  { %2560 = vst [vmem:[#allocation10] sm:$0xff] %v2556_v53  ;;  %v2506_v46 = vadd.f32 %v2505_v37, %v2487_v26 }
 0x1e5   :  { %v2521_v62 = vpop.f32.mrf.mxu2 }
 0x1e6   :  { %v2522_v4 = vadd.f32 %v2521_v62, %v2503_v52  ;;  %v2540_v35 = vpop.f32.mrf.mxu3 }
 0x1e8   :  { %v2541_v5 = vadd.f32 %v2540_v35, %v2522_v4  ;;  %v2488_v12 = vpop.f32.mrf.mxu0 }
 0x1e9   :  { %v2489_v11 = vadd.f32 %v2488_v12, %v2470_v55 }
 0x1ea   :  { %v2557_v60 = vadd.f32 %v3603_v19, %v2541_v5 }
 0x1eb   :  { %v2507_v7 = vpop.f32.mrf.mxu1 }
 0x1ec   :  { %2561 = vst [vmem:[#allocation10 + $0x8] sm:$0xff] %v2557_v60  ;;  %v2508_v50 = vadd.f32 %v2507_v7, %v2489_v11 }
 0x1ed   :  { %v2524_v38 = vpop.f32.mrf.mxu2 }
 0x1ee   :  { %v2525_v61 = vadd.f32 %v2524_v38, %v2506_v46  ;;  %v2543_v45 = vpop.f32.mrf.mxu3 }
 0x1f0   :  { %v2544_v28 = vadd.f32 %v2543_v45, %v2525_v61 }
 0x1f2   :  { %v2558_v36 = vadd.f32 %v3603_v19, %v2544_v28 }
 0x1f4   :  { %2562 = vst [vmem:[#allocation10 + $0x10] sm:$0xff] %v2558_v36 }
 0x1f5   :  { %v2526_v57 = vpop.f32.mrf.mxu2 }
 0x1f6   :  { %v2527_v51 = vadd.f32 %v2526_v57, %v2508_v50  ;;  %v2545_v34 = vpop.f32.mrf.mxu3 }
 0x1f8   :  { %v2546_v23 = vadd.f32 %v2545_v34, %v2527_v51 }
 0x1fa   :  { %v2559_v9 = vadd.f32 %v3603_v19, %v2546_v23 }
 0x1fc   :  { %2563 = vst [vmem:[#allocation10 + $0x18] sm:$0xff] %v2559_v9 }
 0x1fd   :  { %2592 = dma.vmem_to_hbm [thread:$0]  %s2585_s16, 512, %s2587_s19, [#allocation4], %s3864_s30, %s3864_s30, %s3865_s6  }
 0x1fe   :  { %3858 = dma.done.wait [#allocation4], 512  }
 0x1ff   :  { %3859 = vsyncadd [#allocation4], 4294966784 }
 0x200   :  { %2597 = vsyncpa [#allocation3], 1 }
 0x201   :  { %2598 = vsyncpa [#allocation6], 1 }
 0x202   :  { %2599 = vsyncpa [#allocation9], 1 }
 0x203   :  { %2600 = vsyncpa [#allocation4], 1 }

</bundles_post_ra>
